<compile_context>
chip_gen: v7x
topology: tpu7x:2x2x1
jax: 0.10.0
libtpu: 0.0.40
codegen_flags: <defaults>
</compile_context>

<pallas_src>
import functools

import jax
import jax.numpy as jnp
from jax import lax
from jax.experimental import pallas as pl
from jax.experimental.pallas import tpu as pltpu

# Compat shim: newer JAX exposes pltpu.CompilerParams.
_CompilerParams = getattr(pltpu, "CompilerParams", None) or getattr(
    pltpu, "TPUCompilerParams")


def _round_up(x, m):
    return (x + m - 1) // m * m


# ----------------------------------------------------------------------------
# Fused LSTM recurrence + classifier kernel (one batch tile per grid step)
# ----------------------------------------------------------------------------
def _lstm_fused_kernel(gi_ref, len_ref, whh_ref, wfc_ref, bfc_ref, out_ref,
                       *, hidden_pad):
    """Masked (packed-sequence) LSTM recurrence over one batch tile + fused FC.

    gi_ref:  (T, tn, 4Hp) f32  hoisted input projections (x @ W_ih + biases)
    len_ref: (tn, 1)      i32  per-row valid length
    whh_ref: (Hp, 4Hp)    bf16 recurrent weights (gate order i, f, g, o)
    wfc_ref: (Hp, Cp)     f32  classifier weights (fused epilogue)
    bfc_ref: (1, Cp)      f32
    out_ref: (tn, Cp)     f32  logits (lane-dense; sliced to C outside)
    """
    T, tn, _ = gi_ref.shape
    Hp = hidden_pad

    whh = whh_ref[...]      # loop-invariant, bf16
    lens = len_ref[...]     # loop-invariant, (tn, 1) i32

    def step(t, carry):
        h, c = carry
        # Only op on the serial critical path: bf16 MXU matmul, f32 accumulate.
        gates = gi_ref[t] + jnp.dot(h.astype(jnp.bfloat16), whh,
                                    preferred_element_type=jnp.float32)
        # Hp is a multiple of 128 -> each gate slice is whole-vreg lane-aligned.
        i = jax.nn.sigmoid(gates[:, 0 * Hp:1 * Hp])
        f = jax.nn.sigmoid(gates[:, 1 * Hp:2 * Hp])
        g = jnp.tanh(gates[:, 2 * Hp:3 * Hp])
        o = jax.nn.sigmoid(gates[:, 3 * Hp:4 * Hp])
        c_new = f * c + i * g
        h_new = o * jnp.tanh(c_new)
        # packed-sequence semantics: carry state unchanged past padding so the
        # final h equals h at t = len-1 for every row (== PyTorch ht).
        valid = lens > t                      # (tn, 1) -> broadcasts over Hp
        h = jnp.where(valid, h_new, h)
        c = jnp.where(valid, c_new, c)
        return h, c

    h0 = jnp.zeros((tn, Hp), jnp.float32)
    c0 = jnp.zeros((tn, Hp), jnp.float32)
    # T is short and static: fully unroll so the LLO scheduler can overlap the
    # gi[t+1] load and gate VPU/EUP work with the next step's matmul feed.
    ht, _ = lax.fori_loop(0, T, step, (h0, c0), unroll=True)

    # Fused classifier epilogue: logits = ht @ W_fc + b_fc (lane-dense output).
    out_ref[...] = jnp.dot(ht, wfc_ref[...],
                           preferred_element_type=jnp.float32) + bfc_ref[...]


# ----------------------------------------------------------------------------
# Wrapper: embedding + input-projection GEMM in XLA glue, then pallas_call
# ----------------------------------------------------------------------------
def _pick_tile_n(batch):
    """Largest useful batch tile, keeping >=2 grid tiles when possible so the
    batch grid can shard across v7x's 2 TensorCores (harmless on v5e/v6e)."""
    b8 = _round_up(batch, 8)
    if b8 <= 8:
        return 8
    return min(128, _round_up(max(b8 // 2, 8), 8))


def lstm_forward(p, sents, len_per_sent, *, tile_n=None):
    """sents: (B, T) int32 token ids; len_per_sent: (B,) valid lengths."""
    emb = p['emb']
    Hp = p['whh'].shape[0]
    Cp = p['wfc'].shape[1]
    B, T = sents.shape
    if tile_n is None:
        tile_n = _pick_tile_n(B)

    # Pad batch to a multiple of tile_n (padded rows get length 0; their state
    # stays zero, their logits are sliced away below).
    Bp = _round_up(B, tile_n)
    pad = Bp - B
    sents_p = jnp.pad(sents, ((0, pad), (0, 0)))
    lens_col = jnp.pad(len_per_sent.astype(jnp.int32), (0, pad))[:, None]  # (Bp,1)

    # --- XLA glue: embedding gather + input projection for ALL timesteps ----
    # Emitted directly in TIME-MAJOR layout so no HBM transpose of activations
    # is needed around the kernel. One big (Bp*T, E) x (E, 4Hp) GEMM is far
    # better MXU-shaped than per-tile, per-step projections, and lets Pallas
    # double-buffer lane-dense gi tiles while the recurrence runs.
    x_tm = jnp.take(emb, sents_p.T, axis=0)                        # (T, Bp, E)
    E = emb.shape[1]
    gi = jnp.dot(x_tm.reshape(T * Bp, E).astype(jnp.bfloat16), p['wih'],
                 preferred_element_type=jnp.float32)
    gi = gi.reshape(T, Bp, 4 * Hp) + p['bias']                     # (T, Bp, 4Hp)

    grid = (Bp // tile_n,)
    kernel = functools.partial(_lstm_fused_kernel, hidden_pad=Hp)

    # Honest VMEM budget (double-buffered inputs/outputs + headroom), kept well
    # under v7x's 64 MiB physical VMEM.
    tile_bytes = (T * tile_n * 4 * Hp * 4      # gi tile (f32)
                  + tile_n * 4                 # lengths
                  + Hp * 4 * Hp * 2            # W_hh (bf16)
                  + Hp * Cp * 4 + Cp * 4       # W_fc, b_fc
                  + tile_n * Cp * 4)           # out tile
    vmem_limit = min(100 << 20, max(16 << 20, int(2.5 * tile_bytes)))

    logits_pad = pl.pallas_call(
        kernel,
        out_shape=jax.ShapeDtypeStruct((Bp, Cp), jnp.float32),
        grid=grid,
        in_specs=[
            pl.BlockSpec((T, tile_n, 4 * Hp), lambda n: (0, n, 0)),  # gi
            pl.BlockSpec((tile_n, 1), lambda n: (n, 0)),             # lengths
            pl.BlockSpec((Hp, 4 * Hp), lambda n: (0, 0)),            # W_hh bf16
            pl.BlockSpec((Hp, Cp), lambda n: (0, 0)),                # W_fc
            pl.BlockSpec((1, Cp), lambda n: (0, 0)),                 # b_fc
        ],
        out_specs=pl.BlockSpec((tile_n, Cp), lambda n: (n, 0)),
        compiler_params=_CompilerParams(
            dimension_semantics=("parallel",),
            vmem_limit_bytes=vmem_limit),
    )(gi, lens_col, p['whh'], p['wfc'], p['bfc'])

    return logits_pad[:B, :p['num_classes']]


# ----------------------------------------------------------------------------
# Synthetic parameters (PyTorch module shapes, pre-transposed & lane-padded)
# ----------------------------------------------------------------------------
def _pad_gates(w, h, hp):
    """Split last dim into 4 gate blocks of width h, zero-pad each to hp."""
    parts = jnp.split(w, 4, axis=-1)
    pad = [(0, 0)] * (w.ndim - 1) + [(0, hp - h)]
    return jnp.concatenate([jnp.pad(g, pad) for g in parts], axis=-1)


def init_params(key, vocab, emb_dim, hidden, classes, *, lane=128):
    """Weights stored pre-transposed (in_dim x out_dim) and zero-padded so each
    gate occupies a 128-lane-aligned block of width Hp and the classifier
    output is lane-dense (Cp). Zero padding keeps padded hidden columns exactly
    zero through the recurrence."""
    hp = _round_up(hidden, lane)
    cp = _round_up(classes, lane)
    ks = jax.random.split(key, 7)
    g = lambda k, s: 0.1 * jax.random.normal(k, s, dtype=jnp.float32)

    p = {}
    p['emb'] = g(ks[0], (vocab, emb_dim))
    p['wih'] = _pad_gates(g(ks[1], (emb_dim, 4 * hidden)), hidden, hp
                          ).astype(jnp.bfloat16)            # bf16 prologue GEMM
    whh = _pad_gates(g(ks[2], (hidden, 4 * hidden)), hidden, hp)
    p['whh'] = jnp.pad(whh, ((0, hp - hidden), (0, 0))
                       ).astype(jnp.bfloat16)                # bf16 recurrent GEMM
    p['bias'] = _pad_gates(g(ks[3], (1, 4 * hidden)) + g(ks[4], (1, 4 * hidden)),
                           hidden, hp)                       # b_ih + b_hh folded
    p['wfc'] = jnp.pad(g(ks[5], (hidden, classes)),
                       ((0, hp - hidden), (0, cp - classes)))
    p['bfc'] = jnp.pad(g(ks[6], (1, classes)), ((0, 0), (0, cp - classes)))
    p['num_classes'] = classes
    return p


# ----------------------------------------------------------------------------
# Pure-JAX reference (identical math) for the in-script correctness check
# ----------------------------------------------------------------------------
def lstm_reference(p, sents, len_per_sent):
    hp = p['whh'].shape[0]
    x = jnp.take(p['emb'], sents, axis=0)                            # (B, T, E)
    B, T, _ = x.shape
    gi = jnp.dot(x.astype(jnp.bfloat16), p['wih'],
                 preferred_element_type=jnp.float32) + p['bias']     # (B,T,4Hp)
    h = jnp.zeros((B, hp), jnp.float32)
    c = jnp.zeros((B, hp), jnp.float32)
    for t in range(T):
        gates = gi[:, t, :] + jnp.dot(h.astype(jnp.bfloat16), p['whh'],
                                      preferred_element_type=jnp.float32)
        i = jax.nn.sigmoid(gates[:, 0 * hp:1 * hp])
        f = jax.nn.sigmoid(gates[:, 1 * hp:2 * hp])
        g = jnp.tanh(gates[:, 2 * hp:3 * hp])
        o = jax.nn.sigmoid(gates[:, 3 * hp:4 * hp])
        c_new = f * c + i * g
        h_new = o * jnp.tanh(c_new)
        m = (len_per_sent > t)[:, None]
        h = jnp.where(m, h_new, h)
        c = jnp.where(m, c_new, c)
    logits = jnp.dot(h, p['wfc'], preferred_element_type=jnp.float32) + p['bfc']
    return logits[:, :p['num_classes']]


if __name__ == "__main__":
    B, T = 16, 12
    vocab, emb_dim, hidden, classes = 100, 32, 32, 5

    key = jax.random.PRNGKey(0)
    k_tok, k_len, k_par = jax.random.split(key, 3)
    sents = jax.random.randint(k_tok, (B, T), 0, vocab, dtype=jnp.int32)
    len_per_sent = jax.random.randint(k_len, (B,), 1, T + 1, dtype=jnp.int32)

    params = init_params(k_par, vocab, emb_dim, hidden, classes)

    logits = lstm_forward(params, sents, len_per_sent)
    logits = jax.block_until_ready(logits)
    assert logits.shape == (B, classes)

    ref = lstm_reference(params, sents, len_per_sent)
    err = float(jnp.max(jnp.abs(logits - ref)))
    assert err < 5e-2, f"kernel vs reference mismatch: max abs err = {err}"

    print("KERNEL_OK")
</pallas_src>

<mosaic_0001>
module attributes {stable_mosaic.version = 11 : i64} {
  func.func @_lstm_fused_kernel(%arg0: i32, %arg1: memref<12x8x512xf32, #tpu.memory_space<vmem>>, %arg2: memref<8x1xi32, #tpu.memory_space<vmem>>, %arg3: memref<128x512xbf16, #tpu.memory_space<vmem>>, %arg4: memref<128x128xf32, #tpu.memory_space<vmem>>, %arg5: memref<1x128xf32, #tpu.memory_space<vmem>>, %arg6: memref<8x128xf32, #tpu.memory_space<vmem>>) attributes {dimension_semantics = [#tpu.dimension_semantics<parallel>], iteration_bounds = array<i64: 2>, scalar_prefetch = 0 : i64, scratch_operands = 0 : i64, tpu.core_type = #tpu.core_type<tc>, window_params = [{transform_indices = @transform_0, window_bounds = array<i64: 12, 8, 512>}, {transform_indices = @transform_1, window_bounds = array<i64: 8, 1>}, {pipeline_mode = #tpu.pipeline_mode<synchronous>, transform_indices = @transform_2, window_bounds = array<i64: 128, 512>}, {pipeline_mode = #tpu.pipeline_mode<synchronous>, transform_indices = @transform_3, window_bounds = array<i64: 128, 128>}, {pipeline_mode = #tpu.pipeline_mode<synchronous>, transform_indices = @transform_4, window_bounds = array<i64: 1, 128>}, {transform_indices = @transform_5, window_bounds = array<i64: 8, 128>}]} {
    %c0 = arith.constant 0 : index
    %c0_0 = arith.constant 0 : index
    %0 = vector.load %arg3[%c0, %c0_0] : memref<128x512xbf16, #tpu.memory_space<vmem>>, vector<128x512xbf16>
    %c0_1 = arith.constant 0 : index
    %c0_2 = arith.constant 0 : index
    %1 = vector.load %arg2[%c0_1, %c0_2] : memref<8x1xi32, #tpu.memory_space<vmem>>, vector<8x1xi32>
    %cst = arith.constant 0.000000e+00 : f32
    %2 = vector.broadcast %cst : f32 to vector<8x128xf32>
    %cst_3 = arith.constant 0.000000e+00 : f32
    %3 = vector.broadcast %cst_3 : f32 to vector<8x128xf32>
    %c0_i32 = arith.constant 0 : i32
    %4 = arith.index_cast %c0_i32 : i32 to index
    %c0_4 = arith.constant 0 : index
    %c0_5 = arith.constant 0 : index
    %5 = vector.load %arg1[%4, %c0_4, %c0_5] : memref<12x8x512xf32, #tpu.memory_space<vmem>>, vector<1x8x512xf32>
    %6 = vector.shape_cast %5 : vector<1x8x512xf32> to vector<8x512xf32>
    %7 = arith.truncf %2 : vector<8x128xf32> to vector<8x128xbf16>
    %cst_6 = arith.constant dense<0.000000e+00> : vector<8x512xf32>
    %8 = tpu.matmul %7, %0, %cst_6 {dimension_numbers = #tpu.dot_dimension_numbers<[1], [0], [0], [1], [0, 0, 1, 1], [], []>} : vector<8x128xbf16>, vector<128x512xbf16>, vector<8x512xf32> -> vector<8x512xf32>
    %9 = arith.addf %6, %8 : vector<8x512xf32>
    %10 = vector.extract_strided_slice %9 {offsets = [0, 0], sizes = [8, 128], strides = [1, 1]} : vector<8x512xf32> to vector<8x128xf32>
    %11 = arith.negf %10 : vector<8x128xf32>
    %12 = math.exp %11 : vector<8x128xf32>
    %cst_7 = arith.constant 1.000000e+00 : f32
    %13 = vector.broadcast %cst_7 : f32 to vector<8x128xf32>
    %14 = arith.addf %13, %12 : vector<8x128xf32>
    %15 = arith.divf %13, %14 : vector<8x128xf32>
    %16 = vector.extract_strided_slice %9 {offsets = [0, 128], sizes = [8, 128], strides = [1, 1]} : vector<8x512xf32> to vector<8x128xf32>
    %17 = arith.negf %16 : vector<8x128xf32>
    %18 = math.exp %17 : vector<8x128xf32>
    %cst_8 = arith.constant 1.000000e+00 : f32
    %19 = vector.broadcast %cst_8 : f32 to vector<8x128xf32>
    %20 = arith.addf %19, %18 : vector<8x128xf32>
    %21 = arith.divf %19, %20 : vector<8x128xf32>
    %22 = vector.extract_strided_slice %9 {offsets = [0, 256], sizes = [8, 128], strides = [1, 1]} : vector<8x512xf32> to vector<8x128xf32>
    %23 = math.tanh %22 : vector<8x128xf32>
    %24 = vector.extract_strided_slice %9 {offsets = [0, 384], sizes = [8, 128], strides = [1, 1]} : vector<8x512xf32> to vector<8x128xf32>
    %25 = arith.negf %24 : vector<8x128xf32>
    %26 = math.exp %25 : vector<8x128xf32>
    %cst_9 = arith.constant 1.000000e+00 : f32
    %27 = vector.broadcast %cst_9 : f32 to vector<8x128xf32>
    %28 = arith.addf %27, %26 : vector<8x128xf32>
    %29 = arith.divf %27, %28 : vector<8x128xf32>
    %30 = arith.mulf %21, %3 : vector<8x128xf32>
    %31 = arith.mulf %15, %23 : vector<8x128xf32>
    %32 = arith.addf %30, %31 : vector<8x128xf32>
    %33 = math.tanh %32 : vector<8x128xf32>
    %34 = arith.mulf %29, %33 : vector<8x128xf32>
    %35 = vector.broadcast %c0_i32 : i32 to vector<8x1xi32>
    %36 = arith.cmpi sgt, %1, %35 : vector<8x1xi32>
    %37 = vector.shape_cast %36 : vector<8x1xi1> to vector<8x1xi1>
    %38 = vector.broadcast %37 : vector<8x1xi1> to vector<8x128xi1>
    %39 = arith.select %38, %34, %2 : vector<8x128xi1>, vector<8x128xf32>
    %40 = vector.shape_cast %36 : vector<8x1xi1> to vector<8x1xi1>
    %41 = vector.broadcast %40 : vector<8x1xi1> to vector<8x128xi1>
    %42 = arith.select %41, %32, %3 : vector<8x128xi1>, vector<8x128xf32>
    %c1_i32 = arith.constant 1 : i32
    %43 = arith.index_cast %c1_i32 : i32 to index
    %c0_10 = arith.constant 0 : index
    %c0_11 = arith.constant 0 : index
    %44 = vector.load %arg1[%43, %c0_10, %c0_11] : memref<12x8x512xf32, #tpu.memory_space<vmem>>, vector<1x8x512xf32>
    %45 = vector.shape_cast %44 : vector<1x8x512xf32> to vector<8x512xf32>
    %46 = arith.truncf %39 : vector<8x128xf32> to vector<8x128xbf16>
    %cst_12 = arith.constant dense<0.000000e+00> : vector<8x512xf32>
    %47 = tpu.matmul %46, %0, %cst_12 {dimension_numbers = #tpu.dot_dimension_numbers<[1], [0], [0], [1], [0, 0, 1, 1], [], []>} : vector<8x128xbf16>, vector<128x512xbf16>, vector<8x512xf32> -> vector<8x512xf32>
    %48 = arith.addf %45, %47 : vector<8x512xf32>
    %49 = vector.extract_strided_slice %48 {offsets = [0, 0], sizes = [8, 128], strides = [1, 1]} : vector<8x512xf32> to vector<8x128xf32>
    %50 = arith.negf %49 : vector<8x128xf32>
    %51 = math.exp %50 : vector<8x128xf32>
    %cst_13 = arith.constant 1.000000e+00 : f32
    %52 = vector.broadcast %cst_13 : f32 to vector<8x128xf32>
    %53 = arith.addf %52, %51 : vector<8x128xf32>
    %54 = arith.divf %52, %53 : vector<8x128xf32>
    %55 = vector.extract_strided_slice %48 {offsets = [0, 128], sizes = [8, 128], strides = [1, 1]} : vector<8x512xf32> to vector<8x128xf32>
    %56 = arith.negf %55 : vector<8x128xf32>
    %57 = math.exp %56 : vector<8x128xf32>
    %cst_14 = arith.constant 1.000000e+00 : f32
    %58 = vector.broadcast %cst_14 : f32 to vector<8x128xf32>
    %59 = arith.addf %58, %57 : vector<8x128xf32>
    %60 = arith.divf %58, %59 : vector<8x128xf32>
    %61 = vector.extract_strided_slice %48 {offsets = [0, 256], sizes = [8, 128], strides = [1, 1]} : vector<8x512xf32> to vector<8x128xf32>
    %62 = math.tanh %61 : vector<8x128xf32>
    %63 = vector.extract_strided_slice %48 {offsets = [0, 384], sizes = [8, 128], strides = [1, 1]} : vector<8x512xf32> to vector<8x128xf32>
    %64 = arith.negf %63 : vector<8x128xf32>
    %65 = math.exp %64 : vector<8x128xf32>
    %cst_15 = arith.constant 1.000000e+00 : f32
    %66 = vector.broadcast %cst_15 : f32 to vector<8x128xf32>
    %67 = arith.addf %66, %65 : vector<8x128xf32>
    %68 = arith.divf %66, %67 : vector<8x128xf32>
    %69 = arith.mulf %60, %42 : vector<8x128xf32>
    %70 = arith.mulf %54, %62 : vector<8x128xf32>
    %71 = arith.addf %69, %70 : vector<8x128xf32>
    %72 = math.tanh %71 : vector<8x128xf32>
    %73 = arith.mulf %68, %72 : vector<8x128xf32>
    %74 = vector.broadcast %c1_i32 : i32 to vector<8x1xi32>
    %75 = arith.cmpi sgt, %1, %74 : vector<8x1xi32>
    %76 = vector.shape_cast %75 : vector<8x1xi1> to vector<8x1xi1>
    %77 = vector.broadcast %76 : vector<8x1xi1> to vector<8x128xi1>
    %78 = arith.select %77, %73, %39 : vector<8x128xi1>, vector<8x128xf32>
    %79 = vector.shape_cast %75 : vector<8x1xi1> to vector<8x1xi1>
    %80 = vector.broadcast %79 : vector<8x1xi1> to vector<8x128xi1>
    %81 = arith.select %80, %71, %42 : vector<8x128xi1>, vector<8x128xf32>
    %c2_i32 = arith.constant 2 : i32
    %82 = arith.index_cast %c2_i32 : i32 to index
    %c0_16 = arith.constant 0 : index
    %c0_17 = arith.constant 0 : index
    %83 = vector.load %arg1[%82, %c0_16, %c0_17] : memref<12x8x512xf32, #tpu.memory_space<vmem>>, vector<1x8x512xf32>
    %84 = vector.shape_cast %83 : vector<1x8x512xf32> to vector<8x512xf32>
    %85 = arith.truncf %78 : vector<8x128xf32> to vector<8x128xbf16>
    %cst_18 = arith.constant dense<0.000000e+00> : vector<8x512xf32>
    %86 = tpu.matmul %85, %0, %cst_18 {dimension_numbers = #tpu.dot_dimension_numbers<[1], [0], [0], [1], [0, 0, 1, 1], [], []>} : vector<8x128xbf16>, vector<128x512xbf16>, vector<8x512xf32> -> vector<8x512xf32>
    %87 = arith.addf %84, %86 : vector<8x512xf32>
    %88 = vector.extract_strided_slice %87 {offsets = [0, 0], sizes = [8, 128], strides = [1, 1]} : vector<8x512xf32> to vector<8x128xf32>
    %89 = arith.negf %88 : vector<8x128xf32>
    %90 = math.exp %89 : vector<8x128xf32>
    %cst_19 = arith.constant 1.000000e+00 : f32
    %91 = vector.broadcast %cst_19 : f32 to vector<8x128xf32>
    %92 = arith.addf %91, %90 : vector<8x128xf32>
    %93 = arith.divf %91, %92 : vector<8x128xf32>
    %94 = vector.extract_strided_slice %87 {offsets = [0, 128], sizes = [8, 128], strides = [1, 1]} : vector<8x512xf32> to vector<8x128xf32>
    %95 = arith.negf %94 : vector<8x128xf32>
    %96 = math.exp %95 : vector<8x128xf32>
    %cst_20 = arith.constant 1.000000e+00 : f32
    %97 = vector.broadcast %cst_20 : f32 to vector<8x128xf32>
    %98 = arith.addf %97, %96 : vector<8x128xf32>
    %99 = arith.divf %97, %98 : vector<8x128xf32>
    %100 = vector.extract_strided_slice %87 {offsets = [0, 256], sizes = [8, 128], strides = [1, 1]} : vector<8x512xf32> to vector<8x128xf32>
    %101 = math.tanh %100 : vector<8x128xf32>
    %102 = vector.extract_strided_slice %87 {offsets = [0, 384], sizes = [8, 128], strides = [1, 1]} : vector<8x512xf32> to vector<8x128xf32>
    %103 = arith.negf %102 : vector<8x128xf32>
    %104 = math.exp %103 : vector<8x128xf32>
    %cst_21 = arith.constant 1.000000e+00 : f32
    %105 = vector.broadcast %cst_21 : f32 to vector<8x128xf32>
    %106 = arith.addf %105, %104 : vector<8x128xf32>
    %107 = arith.divf %105, %106 : vector<8x128xf32>
    %108 = arith.mulf %99, %81 : vector<8x128xf32>
    %109 = arith.mulf %93, %101 : vector<8x128xf32>
    %110 = arith.addf %108, %109 : vector<8x128xf32>
    %111 = math.tanh %110 : vector<8x128xf32>
    %112 = arith.mulf %107, %111 : vector<8x128xf32>
    %113 = vector.broadcast %c2_i32 : i32 to vector<8x1xi32>
    %114 = arith.cmpi sgt, %1, %113 : vector<8x1xi32>
    %115 = vector.shape_cast %114 : vector<8x1xi1> to vector<8x1xi1>
    %116 = vector.broadcast %115 : vector<8x1xi1> to vector<8x128xi1>
    %117 = arith.select %116, %112, %78 : vector<8x128xi1>, vector<8x128xf32>
    %118 = vector.shape_cast %114 : vector<8x1xi1> to vector<8x1xi1>
    %119 = vector.broadcast %118 : vector<8x1xi1> to vector<8x128xi1>
    %120 = arith.select %119, %110, %81 : vector<8x128xi1>, vector<8x128xf32>
    %c3_i32 = arith.constant 3 : i32
    %121 = arith.index_cast %c3_i32 : i32 to index
    %c0_22 = arith.constant 0 : index
    %c0_23 = arith.constant 0 : index
    %122 = vector.load %arg1[%121, %c0_22, %c0_23] : memref<12x8x512xf32, #tpu.memory_space<vmem>>, vector<1x8x512xf32>
    %123 = vector.shape_cast %122 : vector<1x8x512xf32> to vector<8x512xf32>
    %124 = arith.truncf %117 : vector<8x128xf32> to vector<8x128xbf16>
    %cst_24 = arith.constant dense<0.000000e+00> : vector<8x512xf32>
    %125 = tpu.matmul %124, %0, %cst_24 {dimension_numbers = #tpu.dot_dimension_numbers<[1], [0], [0], [1], [0, 0, 1, 1], [], []>} : vector<8x128xbf16>, vector<128x512xbf16>, vector<8x512xf32> -> vector<8x512xf32>
    %126 = arith.addf %123, %125 : vector<8x512xf32>
    %127 = vector.extract_strided_slice %126 {offsets = [0, 0], sizes = [8, 128], strides = [1, 1]} : vector<8x512xf32> to vector<8x128xf32>
    %128 = arith.negf %127 : vector<8x128xf32>
    %129 = math.exp %128 : vector<8x128xf32>
    %cst_25 = arith.constant 1.000000e+00 : f32
    %130 = vector.broadcast %cst_25 : f32 to vector<8x128xf32>
    %131 = arith.addf %130, %129 : vector<8x128xf32>
    %132 = arith.divf %130, %131 : vector<8x128xf32>
    %133 = vector.extract_strided_slice %126 {offsets = [0, 128], sizes = [8, 128], strides = [1, 1]} : vector<8x512xf32> to vector<8x128xf32>
    %134 = arith.negf %133 : vector<8x128xf32>
    %135 = math.exp %134 : vector<8x128xf32>
    %cst_26 = arith.constant 1.000000e+00 : f32
    %136 = vector.broadcast %cst_26 : f32 to vector<8x128xf32>
    %137 = arith.addf %136, %135 : vector<8x128xf32>
    %138 = arith.divf %136, %137 : vector<8x128xf32>
    %139 = vector.extract_strided_slice %126 {offsets = [0, 256], sizes = [8, 128], strides = [1, 1]} : vector<8x512xf32> to vector<8x128xf32>
    %140 = math.tanh %139 : vector<8x128xf32>
    %141 = vector.extract_strided_slice %126 {offsets = [0, 384], sizes = [8, 128], strides = [1, 1]} : vector<8x512xf32> to vector<8x128xf32>
    %142 = arith.negf %141 : vector<8x128xf32>
    %143 = math.exp %142 : vector<8x128xf32>
    %cst_27 = arith.constant 1.000000e+00 : f32
    %144 = vector.broadcast %cst_27 : f32 to vector<8x128xf32>
    %145 = arith.addf %144, %143 : vector<8x128xf32>
    %146 = arith.divf %144, %145 : vector<8x128xf32>
    %147 = arith.mulf %138, %120 : vector<8x128xf32>
    %148 = arith.mulf %132, %140 : vector<8x128xf32>
    %149 = arith.addf %147, %148 : vector<8x128xf32>
    %150 = math.tanh %149 : vector<8x128xf32>
    %151 = arith.mulf %146, %150 : vector<8x128xf32>
    %152 = vector.broadcast %c3_i32 : i32 to vector<8x1xi32>
    %153 = arith.cmpi sgt, %1, %152 : vector<8x1xi32>
    %154 = vector.shape_cast %153 : vector<8x1xi1> to vector<8x1xi1>
    %155 = vector.broadcast %154 : vector<8x1xi1> to vector<8x128xi1>
    %156 = arith.select %155, %151, %117 : vector<8x128xi1>, vector<8x128xf32>
    %157 = vector.shape_cast %153 : vector<8x1xi1> to vector<8x1xi1>
    %158 = vector.broadcast %157 : vector<8x1xi1> to vector<8x128xi1>
    %159 = arith.select %158, %149, %120 : vector<8x128xi1>, vector<8x128xf32>
    %c4_i32 = arith.constant 4 : i32
    %160 = arith.index_cast %c4_i32 : i32 to index
    %c0_28 = arith.constant 0 : index
    %c0_29 = arith.constant 0 : index
    %161 = vector.load %arg1[%160, %c0_28, %c0_29] : memref<12x8x512xf32, #tpu.memory_space<vmem>>, vector<1x8x512xf32>
    %162 = vector.shape_cast %161 : vector<1x8x512xf32> to vector<8x512xf32>
    %163 = arith.truncf %156 : vector<8x128xf32> to vector<8x128xbf16>
    %cst_30 = arith.constant dense<0.000000e+00> : vector<8x512xf32>
    %164 = tpu.matmul %163, %0, %cst_30 {dimension_numbers = #tpu.dot_dimension_numbers<[1], [0], [0], [1], [0, 0, 1, 1], [], []>} : vector<8x128xbf16>, vector<128x512xbf16>, vector<8x512xf32> -> vector<8x512xf32>
    %165 = arith.addf %162, %164 : vector<8x512xf32>
    %166 = vector.extract_strided_slice %165 {offsets = [0, 0], sizes = [8, 128], strides = [1, 1]} : vector<8x512xf32> to vector<8x128xf32>
    %167 = arith.negf %166 : vector<8x128xf32>
    %168 = math.exp %167 : vector<8x128xf32>
    %cst_31 = arith.constant 1.000000e+00 : f32
    %169 = vector.broadcast %cst_31 : f32 to vector<8x128xf32>
    %170 = arith.addf %169, %168 : vector<8x128xf32>
    %171 = arith.divf %169, %170 : vector<8x128xf32>
    %172 = vector.extract_strided_slice %165 {offsets = [0, 128], sizes = [8, 128], strides = [1, 1]} : vector<8x512xf32> to vector<8x128xf32>
    %173 = arith.negf %172 : vector<8x128xf32>
    %174 = math.exp %173 : vector<8x128xf32>
    %cst_32 = arith.constant 1.000000e+00 : f32
    %175 = vector.broadcast %cst_32 : f32 to vector<8x128xf32>
    %176 = arith.addf %175, %174 : vector<8x128xf32>
    %177 = arith.divf %175, %176 : vector<8x128xf32>
    %178 = vector.extract_strided_slice %165 {offsets = [0, 256], sizes = [8, 128], strides = [1, 1]} : vector<8x512xf32> to vector<8x128xf32>
    %179 = math.tanh %178 : vector<8x128xf32>
    %180 = vector.extract_strided_slice %165 {offsets = [0, 384], sizes = [8, 128], strides = [1, 1]} : vector<8x512xf32> to vector<8x128xf32>
    %181 = arith.negf %180 : vector<8x128xf32>
    %182 = math.exp %181 : vector<8x128xf32>
    %cst_33 = arith.constant 1.000000e+00 : f32
    %183 = vector.broadcast %cst_33 : f32 to vector<8x128xf32>
    %184 = arith.addf %183, %182 : vector<8x128xf32>
    %185 = arith.divf %183, %184 : vector<8x128xf32>
    %186 = arith.mulf %177, %159 : vector<8x128xf32>
    %187 = arith.mulf %171, %179 : vector<8x128xf32>
    %188 = arith.addf %186, %187 : vector<8x128xf32>
    %189 = math.tanh %188 : vector<8x128xf32>
    %190 = arith.mulf %185, %189 : vector<8x128xf32>
    %191 = vector.broadcast %c4_i32 : i32 to vector<8x1xi32>
    %192 = arith.cmpi sgt, %1, %191 : vector<8x1xi32>
    %193 = vector.shape_cast %192 : vector<8x1xi1> to vector<8x1xi1>
    %194 = vector.broadcast %193 : vector<8x1xi1> to vector<8x128xi1>
    %195 = arith.select %194, %190, %156 : vector<8x128xi1>, vector<8x128xf32>
    %196 = vector.shape_cast %192 : vector<8x1xi1> to vector<8x1xi1>
    %197 = vector.broadcast %196 : vector<8x1xi1> to vector<8x128xi1>
    %198 = arith.select %197, %188, %159 : vector<8x128xi1>, vector<8x128xf32>
    %c5_i32 = arith.constant 5 : i32
    %199 = arith.index_cast %c5_i32 : i32 to index
    %c0_34 = arith.constant 0 : index
    %c0_35 = arith.constant 0 : index
    %200 = vector.load %arg1[%199, %c0_34, %c0_35] : memref<12x8x512xf32, #tpu.memory_space<vmem>>, vector<1x8x512xf32>
    %201 = vector.shape_cast %200 : vector<1x8x512xf32> to vector<8x512xf32>
    %202 = arith.truncf %195 : vector<8x128xf32> to vector<8x128xbf16>
    %cst_36 = arith.constant dense<0.000000e+00> : vector<8x512xf32>
    %203 = tpu.matmul %202, %0, %cst_36 {dimension_numbers = #tpu.dot_dimension_numbers<[1], [0], [0], [1], [0, 0, 1, 1], [], []>} : vector<8x128xbf16>, vector<128x512xbf16>, vector<8x512xf32> -> vector<8x512xf32>
    %204 = arith.addf %201, %203 : vector<8x512xf32>
    %205 = vector.extract_strided_slice %204 {offsets = [0, 0], sizes = [8, 128], strides = [1, 1]} : vector<8x512xf32> to vector<8x128xf32>
    %206 = arith.negf %205 : vector<8x128xf32>
    %207 = math.exp %206 : vector<8x128xf32>
    %cst_37 = arith.constant 1.000000e+00 : f32
    %208 = vector.broadcast %cst_37 : f32 to vector<8x128xf32>
    %209 = arith.addf %208, %207 : vector<8x128xf32>
    %210 = arith.divf %208, %209 : vector<8x128xf32>
    %211 = vector.extract_strided_slice %204 {offsets = [0, 128], sizes = [8, 128], strides = [1, 1]} : vector<8x512xf32> to vector<8x128xf32>
    %212 = arith.negf %211 : vector<8x128xf32>
    %213 = math.exp %212 : vector<8x128xf32>
    %cst_38 = arith.constant 1.000000e+00 : f32
    %214 = vector.broadcast %cst_38 : f32 to vector<8x128xf32>
    %215 = arith.addf %214, %213 : vector<8x128xf32>
    %216 = arith.divf %214, %215 : vector<8x128xf32>
    %217 = vector.extract_strided_slice %204 {offsets = [0, 256], sizes = [8, 128], strides = [1, 1]} : vector<8x512xf32> to vector<8x128xf32>
    %218 = math.tanh %217 : vector<8x128xf32>
    %219 = vector.extract_strided_slice %204 {offsets = [0, 384], sizes = [8, 128], strides = [1, 1]} : vector<8x512xf32> to vector<8x128xf32>
    %220 = arith.negf %219 : vector<8x128xf32>
    %221 = math.exp %220 : vector<8x128xf32>
    %cst_39 = arith.constant 1.000000e+00 : f32
    %222 = vector.broadcast %cst_39 : f32 to vector<8x128xf32>
    %223 = arith.addf %222, %221 : vector<8x128xf32>
    %224 = arith.divf %222, %223 : vector<8x128xf32>
    %225 = arith.mulf %216, %198 : vector<8x128xf32>
    %226 = arith.mulf %210, %218 : vector<8x128xf32>
    %227 = arith.addf %225, %226 : vector<8x128xf32>
    %228 = math.tanh %227 : vector<8x128xf32>
    %229 = arith.mulf %224, %228 : vector<8x128xf32>
    %230 = vector.broadcast %c5_i32 : i32 to vector<8x1xi32>
    %231 = arith.cmpi sgt, %1, %230 : vector<8x1xi32>
    %232 = vector.shape_cast %231 : vector<8x1xi1> to vector<8x1xi1>
    %233 = vector.broadcast %232 : vector<8x1xi1> to vector<8x128xi1>
    %234 = arith.select %233, %229, %195 : vector<8x128xi1>, vector<8x128xf32>
    %235 = vector.shape_cast %231 : vector<8x1xi1> to vector<8x1xi1>
    %236 = vector.broadcast %235 : vector<8x1xi1> to vector<8x128xi1>
    %237 = arith.select %236, %227, %198 : vector<8x128xi1>, vector<8x128xf32>
    %c6_i32 = arith.constant 6 : i32
    %238 = arith.index_cast %c6_i32 : i32 to index
    %c0_40 = arith.constant 0 : index
    %c0_41 = arith.constant 0 : index
    %239 = vector.load %arg1[%238, %c0_40, %c0_41] : memref<12x8x512xf32, #tpu.memory_space<vmem>>, vector<1x8x512xf32>
    %240 = vector.shape_cast %239 : vector<1x8x512xf32> to vector<8x512xf32>
    %241 = arith.truncf %234 : vector<8x128xf32> to vector<8x128xbf16>
    %cst_42 = arith.constant dense<0.000000e+00> : vector<8x512xf32>
    %242 = tpu.matmul %241, %0, %cst_42 {dimension_numbers = #tpu.dot_dimension_numbers<[1], [0], [0], [1], [0, 0, 1, 1], [], []>} : vector<8x128xbf16>, vector<128x512xbf16>, vector<8x512xf32> -> vector<8x512xf32>
    %243 = arith.addf %240, %242 : vector<8x512xf32>
    %244 = vector.extract_strided_slice %243 {offsets = [0, 0], sizes = [8, 128], strides = [1, 1]} : vector<8x512xf32> to vector<8x128xf32>
    %245 = arith.negf %244 : vector<8x128xf32>
    %246 = math.exp %245 : vector<8x128xf32>
    %cst_43 = arith.constant 1.000000e+00 : f32
    %247 = vector.broadcast %cst_43 : f32 to vector<8x128xf32>
    %248 = arith.addf %247, %246 : vector<8x128xf32>
    %249 = arith.divf %247, %248 : vector<8x128xf32>
    %250 = vector.extract_strided_slice %243 {offsets = [0, 128], sizes = [8, 128], strides = [1, 1]} : vector<8x512xf32> to vector<8x128xf32>
    %251 = arith.negf %250 : vector<8x128xf32>
    %252 = math.exp %251 : vector<8x128xf32>
    %cst_44 = arith.constant 1.000000e+00 : f32
    %253 = vector.broadcast %cst_44 : f32 to vector<8x128xf32>
    %254 = arith.addf %253, %252 : vector<8x128xf32>
    %255 = arith.divf %253, %254 : vector<8x128xf32>
    %256 = vector.extract_strided_slice %243 {offsets = [0, 256], sizes = [8, 128], strides = [1, 1]} : vector<8x512xf32> to vector<8x128xf32>
    %257 = math.tanh %256 : vector<8x128xf32>
    %258 = vector.extract_strided_slice %243 {offsets = [0, 384], sizes = [8, 128], strides = [1, 1]} : vector<8x512xf32> to vector<8x128xf32>
    %259 = arith.negf %258 : vector<8x128xf32>
    %260 = math.exp %259 : vector<8x128xf32>
    %cst_45 = arith.constant 1.000000e+00 : f32
    %261 = vector.broadcast %cst_45 : f32 to vector<8x128xf32>
    %262 = arith.addf %261, %260 : vector<8x128xf32>
    %263 = arith.divf %261, %262 : vector<8x128xf32>
    %264 = arith.mulf %255, %237 : vector<8x128xf32>
    %265 = arith.mulf %249, %257 : vector<8x128xf32>
    %266 = arith.addf %264, %265 : vector<8x128xf32>
    %267 = math.tanh %266 : vector<8x128xf32>
    %268 = arith.mulf %263, %267 : vector<8x128xf32>
    %269 = vector.broadcast %c6_i32 : i32 to vector<8x1xi32>
    %270 = arith.cmpi sgt, %1, %269 : vector<8x1xi32>
    %271 = vector.shape_cast %270 : vector<8x1xi1> to vector<8x1xi1>
    %272 = vector.broadcast %271 : vector<8x1xi1> to vector<8x128xi1>
    %273 = arith.select %272, %268, %234 : vector<8x128xi1>, vector<8x128xf32>
    %274 = vector.shape_cast %270 : vector<8x1xi1> to vector<8x1xi1>
    %275 = vector.broadcast %274 : vector<8x1xi1> to vector<8x128xi1>
    %276 = arith.select %275, %266, %237 : vector<8x128xi1>, vector<8x128xf32>
    %c7_i32 = arith.constant 7 : i32
    %277 = arith.index_cast %c7_i32 : i32 to index
    %c0_46 = arith.constant 0 : index
    %c0_47 = arith.constant 0 : index
    %278 = vector.load %arg1[%277, %c0_46, %c0_47] : memref<12x8x512xf32, #tpu.memory_space<vmem>>, vector<1x8x512xf32>
    %279 = vector.shape_cast %278 : vector<1x8x512xf32> to vector<8x512xf32>
    %280 = arith.truncf %273 : vector<8x128xf32> to vector<8x128xbf16>
    %cst_48 = arith.constant dense<0.000000e+00> : vector<8x512xf32>
    %281 = tpu.matmul %280, %0, %cst_48 {dimension_numbers = #tpu.dot_dimension_numbers<[1], [0], [0], [1], [0, 0, 1, 1], [], []>} : vector<8x128xbf16>, vector<128x512xbf16>, vector<8x512xf32> -> vector<8x512xf32>
    %282 = arith.addf %279, %281 : vector<8x512xf32>
    %283 = vector.extract_strided_slice %282 {offsets = [0, 0], sizes = [8, 128], strides = [1, 1]} : vector<8x512xf32> to vector<8x128xf32>
    %284 = arith.negf %283 : vector<8x128xf32>
    %285 = math.exp %284 : vector<8x128xf32>
    %cst_49 = arith.constant 1.000000e+00 : f32
    %286 = vector.broadcast %cst_49 : f32 to vector<8x128xf32>
    %287 = arith.addf %286, %285 : vector<8x128xf32>
    %288 = arith.divf %286, %287 : vector<8x128xf32>
    %289 = vector.extract_strided_slice %282 {offsets = [0, 128], sizes = [8, 128], strides = [1, 1]} : vector<8x512xf32> to vector<8x128xf32>
    %290 = arith.negf %289 : vector<8x128xf32>
    %291 = math.exp %290 : vector<8x128xf32>
    %cst_50 = arith.constant 1.000000e+00 : f32
    %292 = vector.broadcast %cst_50 : f32 to vector<8x128xf32>
    %293 = arith.addf %292, %291 : vector<8x128xf32>
    %294 = arith.divf %292, %293 : vector<8x128xf32>
    %295 = vector.extract_strided_slice %282 {offsets = [0, 256], sizes = [8, 128], strides = [1, 1]} : vector<8x512xf32> to vector<8x128xf32>
    %296 = math.tanh %295 : vector<8x128xf32>
    %297 = vector.extract_strided_slice %282 {offsets = [0, 384], sizes = [8, 128], strides = [1, 1]} : vector<8x512xf32> to vector<8x128xf32>
    %298 = arith.negf %297 : vector<8x128xf32>
    %299 = math.exp %298 : vector<8x128xf32>
    %cst_51 = arith.constant 1.000000e+00 : f32
    %300 = vector.broadcast %cst_51 : f32 to vector<8x128xf32>
    %301 = arith.addf %300, %299 : vector<8x128xf32>
    %302 = arith.divf %300, %301 : vector<8x128xf32>
    %303 = arith.mulf %294, %276 : vector<8x128xf32>
    %304 = arith.mulf %288, %296 : vector<8x128xf32>
    %305 = arith.addf %303, %304 : vector<8x128xf32>
    %306 = math.tanh %305 : vector<8x128xf32>
    %307 = arith.mulf %302, %306 : vector<8x128xf32>
    %308 = vector.broadcast %c7_i32 : i32 to vector<8x1xi32>
    %309 = arith.cmpi sgt, %1, %308 : vector<8x1xi32>
    %310 = vector.shape_cast %309 : vector<8x1xi1> to vector<8x1xi1>
    %311 = vector.broadcast %310 : vector<8x1xi1> to vector<8x128xi1>
    %312 = arith.select %311, %307, %273 : vector<8x128xi1>, vector<8x128xf32>
    %313 = vector.shape_cast %309 : vector<8x1xi1> to vector<8x1xi1>
    %314 = vector.broadcast %313 : vector<8x1xi1> to vector<8x128xi1>
    %315 = arith.select %314, %305, %276 : vector<8x128xi1>, vector<8x128xf32>
    %c8_i32 = arith.constant 8 : i32
    %316 = arith.index_cast %c8_i32 : i32 to index
    %c0_52 = arith.constant 0 : index
    %c0_53 = arith.constant 0 : index
    %317 = vector.load %arg1[%316, %c0_52, %c0_53] : memref<12x8x512xf32, #tpu.memory_space<vmem>>, vector<1x8x512xf32>
    %318 = vector.shape_cast %317 : vector<1x8x512xf32> to vector<8x512xf32>
    %319 = arith.truncf %312 : vector<8x128xf32> to vector<8x128xbf16>
    %cst_54 = arith.constant dense<0.000000e+00> : vector<8x512xf32>
    %320 = tpu.matmul %319, %0, %cst_54 {dimension_numbers = #tpu.dot_dimension_numbers<[1], [0], [0], [1], [0, 0, 1, 1], [], []>} : vector<8x128xbf16>, vector<128x512xbf16>, vector<8x512xf32> -> vector<8x512xf32>
    %321 = arith.addf %318, %320 : vector<8x512xf32>
    %322 = vector.extract_strided_slice %321 {offsets = [0, 0], sizes = [8, 128], strides = [1, 1]} : vector<8x512xf32> to vector<8x128xf32>
    %323 = arith.negf %322 : vector<8x128xf32>
    %324 = math.exp %323 : vector<8x128xf32>
    %cst_55 = arith.constant 1.000000e+00 : f32
    %325 = vector.broadcast %cst_55 : f32 to vector<8x128xf32>
    %326 = arith.addf %325, %324 : vector<8x128xf32>
    %327 = arith.divf %325, %326 : vector<8x128xf32>
    %328 = vector.extract_strided_slice %321 {offsets = [0, 128], sizes = [8, 128], strides = [1, 1]} : vector<8x512xf32> to vector<8x128xf32>
    %329 = arith.negf %328 : vector<8x128xf32>
    %330 = math.exp %329 : vector<8x128xf32>
    %cst_56 = arith.constant 1.000000e+00 : f32
    %331 = vector.broadcast %cst_56 : f32 to vector<8x128xf32>
    %332 = arith.addf %331, %330 : vector<8x128xf32>
    %333 = arith.divf %331, %332 : vector<8x128xf32>
    %334 = vector.extract_strided_slice %321 {offsets = [0, 256], sizes = [8, 128], strides = [1, 1]} : vector<8x512xf32> to vector<8x128xf32>
    %335 = math.tanh %334 : vector<8x128xf32>
    %336 = vector.extract_strided_slice %321 {offsets = [0, 384], sizes = [8, 128], strides = [1, 1]} : vector<8x512xf32> to vector<8x128xf32>
    %337 = arith.negf %336 : vector<8x128xf32>
    %338 = math.exp %337 : vector<8x128xf32>
    %cst_57 = arith.constant 1.000000e+00 : f32
    %339 = vector.broadcast %cst_57 : f32 to vector<8x128xf32>
    %340 = arith.addf %339, %338 : vector<8x128xf32>
    %341 = arith.divf %339, %340 : vector<8x128xf32>
    %342 = arith.mulf %333, %315 : vector<8x128xf32>
    %343 = arith.mulf %327, %335 : vector<8x128xf32>
    %344 = arith.addf %342, %343 : vector<8x128xf32>
    %345 = math.tanh %344 : vector<8x128xf32>
    %346 = arith.mulf %341, %345 : vector<8x128xf32>
    %347 = vector.broadcast %c8_i32 : i32 to vector<8x1xi32>
    %348 = arith.cmpi sgt, %1, %347 : vector<8x1xi32>
    %349 = vector.shape_cast %348 : vector<8x1xi1> to vector<8x1xi1>
    %350 = vector.broadcast %349 : vector<8x1xi1> to vector<8x128xi1>
    %351 = arith.select %350, %346, %312 : vector<8x128xi1>, vector<8x128xf32>
    %352 = vector.shape_cast %348 : vector<8x1xi1> to vector<8x1xi1>
    %353 = vector.broadcast %352 : vector<8x1xi1> to vector<8x128xi1>
    %354 = arith.select %353, %344, %315 : vector<8x128xi1>, vector<8x128xf32>
    %c9_i32 = arith.constant 9 : i32
    %355 = arith.index_cast %c9_i32 : i32 to index
    %c0_58 = arith.constant 0 : index
    %c0_59 = arith.constant 0 : index
    %356 = vector.load %arg1[%355, %c0_58, %c0_59] : memref<12x8x512xf32, #tpu.memory_space<vmem>>, vector<1x8x512xf32>
    %357 = vector.shape_cast %356 : vector<1x8x512xf32> to vector<8x512xf32>
    %358 = arith.truncf %351 : vector<8x128xf32> to vector<8x128xbf16>
    %cst_60 = arith.constant dense<0.000000e+00> : vector<8x512xf32>
    %359 = tpu.matmul %358, %0, %cst_60 {dimension_numbers = #tpu.dot_dimension_numbers<[1], [0], [0], [1], [0, 0, 1, 1], [], []>} : vector<8x128xbf16>, vector<128x512xbf16>, vector<8x512xf32> -> vector<8x512xf32>
    %360 = arith.addf %357, %359 : vector<8x512xf32>
    %361 = vector.extract_strided_slice %360 {offsets = [0, 0], sizes = [8, 128], strides = [1, 1]} : vector<8x512xf32> to vector<8x128xf32>
    %362 = arith.negf %361 : vector<8x128xf32>
    %363 = math.exp %362 : vector<8x128xf32>
    %cst_61 = arith.constant 1.000000e+00 : f32
    %364 = vector.broadcast %cst_61 : f32 to vector<8x128xf32>
    %365 = arith.addf %364, %363 : vector<8x128xf32>
    %366 = arith.divf %364, %365 : vector<8x128xf32>
    %367 = vector.extract_strided_slice %360 {offsets = [0, 128], sizes = [8, 128], strides = [1, 1]} : vector<8x512xf32> to vector<8x128xf32>
    %368 = arith.negf %367 : vector<8x128xf32>
    %369 = math.exp %368 : vector<8x128xf32>
    %cst_62 = arith.constant 1.000000e+00 : f32
    %370 = vector.broadcast %cst_62 : f32 to vector<8x128xf32>
    %371 = arith.addf %370, %369 : vector<8x128xf32>
    %372 = arith.divf %370, %371 : vector<8x128xf32>
    %373 = vector.extract_strided_slice %360 {offsets = [0, 256], sizes = [8, 128], strides = [1, 1]} : vector<8x512xf32> to vector<8x128xf32>
    %374 = math.tanh %373 : vector<8x128xf32>
    %375 = vector.extract_strided_slice %360 {offsets = [0, 384], sizes = [8, 128], strides = [1, 1]} : vector<8x512xf32> to vector<8x128xf32>
    %376 = arith.negf %375 : vector<8x128xf32>
    %377 = math.exp %376 : vector<8x128xf32>
    %cst_63 = arith.constant 1.000000e+00 : f32
    %378 = vector.broadcast %cst_63 : f32 to vector<8x128xf32>
    %379 = arith.addf %378, %377 : vector<8x128xf32>
    %380 = arith.divf %378, %379 : vector<8x128xf32>
    %381 = arith.mulf %372, %354 : vector<8x128xf32>
    %382 = arith.mulf %366, %374 : vector<8x128xf32>
    %383 = arith.addf %381, %382 : vector<8x128xf32>
    %384 = math.tanh %383 : vector<8x128xf32>
    %385 = arith.mulf %380, %384 : vector<8x128xf32>
    %386 = vector.broadcast %c9_i32 : i32 to vector<8x1xi32>
    %387 = arith.cmpi sgt, %1, %386 : vector<8x1xi32>
    %388 = vector.shape_cast %387 : vector<8x1xi1> to vector<8x1xi1>
    %389 = vector.broadcast %388 : vector<8x1xi1> to vector<8x128xi1>
    %390 = arith.select %389, %385, %351 : vector<8x128xi1>, vector<8x128xf32>
    %391 = vector.shape_cast %387 : vector<8x1xi1> to vector<8x1xi1>
    %392 = vector.broadcast %391 : vector<8x1xi1> to vector<8x128xi1>
    %393 = arith.select %392, %383, %354 : vector<8x128xi1>, vector<8x128xf32>
    %c10_i32 = arith.constant 10 : i32
    %394 = arith.index_cast %c10_i32 : i32 to index
    %c0_64 = arith.constant 0 : index
    %c0_65 = arith.constant 0 : index
    %395 = vector.load %arg1[%394, %c0_64, %c0_65] : memref<12x8x512xf32, #tpu.memory_space<vmem>>, vector<1x8x512xf32>
    %396 = vector.shape_cast %395 : vector<1x8x512xf32> to vector<8x512xf32>
    %397 = arith.truncf %390 : vector<8x128xf32> to vector<8x128xbf16>
    %cst_66 = arith.constant dense<0.000000e+00> : vector<8x512xf32>
    %398 = tpu.matmul %397, %0, %cst_66 {dimension_numbers = #tpu.dot_dimension_numbers<[1], [0], [0], [1], [0, 0, 1, 1], [], []>} : vector<8x128xbf16>, vector<128x512xbf16>, vector<8x512xf32> -> vector<8x512xf32>
    %399 = arith.addf %396, %398 : vector<8x512xf32>
    %400 = vector.extract_strided_slice %399 {offsets = [0, 0], sizes = [8, 128], strides = [1, 1]} : vector<8x512xf32> to vector<8x128xf32>
    %401 = arith.negf %400 : vector<8x128xf32>
    %402 = math.exp %401 : vector<8x128xf32>
    %cst_67 = arith.constant 1.000000e+00 : f32
    %403 = vector.broadcast %cst_67 : f32 to vector<8x128xf32>
    %404 = arith.addf %403, %402 : vector<8x128xf32>
    %405 = arith.divf %403, %404 : vector<8x128xf32>
    %406 = vector.extract_strided_slice %399 {offsets = [0, 128], sizes = [8, 128], strides = [1, 1]} : vector<8x512xf32> to vector<8x128xf32>
    %407 = arith.negf %406 : vector<8x128xf32>
    %408 = math.exp %407 : vector<8x128xf32>
    %cst_68 = arith.constant 1.000000e+00 : f32
    %409 = vector.broadcast %cst_68 : f32 to vector<8x128xf32>
    %410 = arith.addf %409, %408 : vector<8x128xf32>
    %411 = arith.divf %409, %410 : vector<8x128xf32>
    %412 = vector.extract_strided_slice %399 {offsets = [0, 256], sizes = [8, 128], strides = [1, 1]} : vector<8x512xf32> to vector<8x128xf32>
    %413 = math.tanh %412 : vector<8x128xf32>
    %414 = vector.extract_strided_slice %399 {offsets = [0, 384], sizes = [8, 128], strides = [1, 1]} : vector<8x512xf32> to vector<8x128xf32>
    %415 = arith.negf %414 : vector<8x128xf32>
    %416 = math.exp %415 : vector<8x128xf32>
    %cst_69 = arith.constant 1.000000e+00 : f32
    %417 = vector.broadcast %cst_69 : f32 to vector<8x128xf32>
    %418 = arith.addf %417, %416 : vector<8x128xf32>
    %419 = arith.divf %417, %418 : vector<8x128xf32>
    %420 = arith.mulf %411, %393 : vector<8x128xf32>
    %421 = arith.mulf %405, %413 : vector<8x128xf32>
    %422 = arith.addf %420, %421 : vector<8x128xf32>
    %423 = math.tanh %422 : vector<8x128xf32>
    %424 = arith.mulf %419, %423 : vector<8x128xf32>
    %425 = vector.broadcast %c10_i32 : i32 to vector<8x1xi32>
    %426 = arith.cmpi sgt, %1, %425 : vector<8x1xi32>
    %427 = vector.shape_cast %426 : vector<8x1xi1> to vector<8x1xi1>
    %428 = vector.broadcast %427 : vector<8x1xi1> to vector<8x128xi1>
    %429 = arith.select %428, %424, %390 : vector<8x128xi1>, vector<8x128xf32>
    %430 = vector.shape_cast %426 : vector<8x1xi1> to vector<8x1xi1>
    %431 = vector.broadcast %430 : vector<8x1xi1> to vector<8x128xi1>
    %432 = arith.select %431, %422, %393 : vector<8x128xi1>, vector<8x128xf32>
    %c11_i32 = arith.constant 11 : i32
    %433 = arith.index_cast %c11_i32 : i32 to index
    %c0_70 = arith.constant 0 : index
    %c0_71 = arith.constant 0 : index
    %434 = vector.load %arg1[%433, %c0_70, %c0_71] : memref<12x8x512xf32, #tpu.memory_space<vmem>>, vector<1x8x512xf32>
    %435 = vector.shape_cast %434 : vector<1x8x512xf32> to vector<8x512xf32>
    %436 = arith.truncf %429 : vector<8x128xf32> to vector<8x128xbf16>
    %cst_72 = arith.constant dense<0.000000e+00> : vector<8x512xf32>
    %437 = tpu.matmul %436, %0, %cst_72 {dimension_numbers = #tpu.dot_dimension_numbers<[1], [0], [0], [1], [0, 0, 1, 1], [], []>} : vector<8x128xbf16>, vector<128x512xbf16>, vector<8x512xf32> -> vector<8x512xf32>
    %438 = arith.addf %435, %437 : vector<8x512xf32>
    %439 = vector.extract_strided_slice %438 {offsets = [0, 0], sizes = [8, 128], strides = [1, 1]} : vector<8x512xf32> to vector<8x128xf32>
    %440 = arith.negf %439 : vector<8x128xf32>
    %441 = math.exp %440 : vector<8x128xf32>
    %cst_73 = arith.constant 1.000000e+00 : f32
    %442 = vector.broadcast %cst_73 : f32 to vector<8x128xf32>
    %443 = arith.addf %442, %441 : vector<8x128xf32>
    %444 = arith.divf %442, %443 : vector<8x128xf32>
    %445 = vector.extract_strided_slice %438 {offsets = [0, 128], sizes = [8, 128], strides = [1, 1]} : vector<8x512xf32> to vector<8x128xf32>
    %446 = arith.negf %445 : vector<8x128xf32>
    %447 = math.exp %446 : vector<8x128xf32>
    %cst_74 = arith.constant 1.000000e+00 : f32
    %448 = vector.broadcast %cst_74 : f32 to vector<8x128xf32>
    %449 = arith.addf %448, %447 : vector<8x128xf32>
    %450 = arith.divf %448, %449 : vector<8x128xf32>
    %451 = vector.extract_strided_slice %438 {offsets = [0, 256], sizes = [8, 128], strides = [1, 1]} : vector<8x512xf32> to vector<8x128xf32>
    %452 = math.tanh %451 : vector<8x128xf32>
    %453 = vector.extract_strided_slice %438 {offsets = [0, 384], sizes = [8, 128], strides = [1, 1]} : vector<8x512xf32> to vector<8x128xf32>
    %454 = arith.negf %453 : vector<8x128xf32>
    %455 = math.exp %454 : vector<8x128xf32>
    %cst_75 = arith.constant 1.000000e+00 : f32
    %456 = vector.broadcast %cst_75 : f32 to vector<8x128xf32>
    %457 = arith.addf %456, %455 : vector<8x128xf32>
    %458 = arith.divf %456, %457 : vector<8x128xf32>
    %459 = arith.mulf %450, %432 : vector<8x128xf32>
    %460 = arith.mulf %444, %452 : vector<8x128xf32>
    %461 = arith.addf %459, %460 : vector<8x128xf32>
    %462 = math.tanh %461 : vector<8x128xf32>
    %463 = arith.mulf %458, %462 : vector<8x128xf32>
    %464 = vector.broadcast %c11_i32 : i32 to vector<8x1xi32>
    %465 = arith.cmpi sgt, %1, %464 : vector<8x1xi32>
    %466 = vector.shape_cast %465 : vector<8x1xi1> to vector<8x1xi1>
    %467 = vector.broadcast %466 : vector<8x1xi1> to vector<8x128xi1>
    %468 = arith.select %467, %463, %429 : vector<8x128xi1>, vector<8x128xf32>
    %469 = vector.shape_cast %465 : vector<8x1xi1> to vector<8x1xi1>
    %470 = vector.broadcast %469 : vector<8x1xi1> to vector<8x128xi1>
    %471 = arith.select %470, %461, %432 : vector<8x128xi1>, vector<8x128xf32>
    %c12_i32 = arith.constant 12 : i32
    %c0_76 = arith.constant 0 : index
    %c0_77 = arith.constant 0 : index
    %472 = vector.load %arg4[%c0_76, %c0_77] : memref<128x128xf32, #tpu.memory_space<vmem>>, vector<128x128xf32>
    %cst_78 = arith.constant dense<0.000000e+00> : vector<8x128xf32>
    %473 = tpu.matmul %468, %472, %cst_78 {dimension_numbers = #tpu.dot_dimension_numbers<[1], [0], [0], [1], [0, 0, 1, 1], [], []>} : vector<8x128xf32>, vector<128x128xf32>, vector<8x128xf32> -> vector<8x128xf32>
    %c0_79 = arith.constant 0 : index
    %c0_80 = arith.constant 0 : index
    %474 = vector.load %arg5[%c0_79, %c0_80] : memref<1x128xf32, #tpu.memory_space<vmem>>, vector<1x128xf32>
    %475 = vector.broadcast %474 : vector<1x128xf32> to vector<8x128xf32>
    %476 = arith.addf %473, %475 : vector<8x128xf32>
    %c0_81 = arith.constant 0 : index
    %c0_82 = arith.constant 0 : index
    %477 = vector.load %arg6[%c0_81, %c0_82] : memref<8x128xf32, #tpu.memory_space<vmem>>, vector<8x128xf32>
    tpu.vector_store %arg6[%c0_81, %c0_82], %476 {strides = array<i32>} : memref<8x128xf32, #tpu.memory_space<vmem>>, vector<8x128xf32>,
    return
  }
  func.func @transform_0(%arg0: i32) -> (i32, i32, i32) {
    %c0_i32 = arith.constant 0 : i32
    %c0_i32_0 = arith.constant 0 : i32
    %c0_i32_1 = arith.constant 0 : i32
    return %c0_i32, %arg0, %c0_i32_0 : i32, i32, i32
  }
  func.func @transform_1(%arg0: i32) -> (i32, i32) {
    %c0_i32 = arith.constant 0 : i32
    %c0_i32_0 = arith.constant 0 : i32
    return %arg0, %c0_i32 : i32, i32
  }
  func.func @transform_2(%arg0: i32) -> (i32, i32) {
    %c0_i32 = arith.constant 0 : i32
    %c0_i32_0 = arith.constant 0 : i32
    %c0_i32_1 = arith.constant 0 : i32
    return %c0_i32, %c0_i32_0 : i32, i32
  }
  func.func @transform_3(%arg0: i32) -> (i32, i32) {
    %c0_i32 = arith.constant 0 : i32
    %c0_i32_0 = arith.constant 0 : i32
    %c0_i32_1 = arith.constant 0 : i32
    return %c0_i32, %c0_i32_0 : i32, i32
  }
  func.func @transform_4(%arg0: i32) -> (i32, i32) {
    %c0_i32 = arith.constant 0 : i32
    %c0_i32_0 = arith.constant 0 : i32
    %c0_i32_1 = arith.constant 0 : i32
    return %c0_i32, %c0_i32_0 : i32, i32
  }
  func.func @transform_5(%arg0: i32) -> (i32, i32) {
    %c0_i32 = arith.constant 0 : i32
    %c0_i32_0 = arith.constant 0 : i32
    return %arg0, %c0_i32 : i32, i32
  }
}

</mosaic_0001>

<bundles_post_ra>
// kernel: tpu_custom_call.1
= control target key start
LH: loop header
LB: loop body
LE: loop exit
PB: predicated region body
PF: predicated region fallthrough
CT: control target
= control target key end

     0   :  { %s3903_s0 = inlined_call_operand.hbm [shape: f32[12,16,512], index: 0, kind: input, shape index: {}]   ;;  %s3904_s1 = inlined_call_operand.vmem [shape: s32[16,1], index: 1, kind: input, shape index: {}]   ;;  %s3905_s2 = inlined_call_operand.hbm [shape: bf16[128,512], index: 2, kind: input, shape index: {}]   ;;  %s3906_s3 = inlined_call_operand.hbm [shape: f32[128,128], index: 3, kind: input, shape index: {}]   ;;  %s3907_s4 = inlined_call_operand.vmem [shape: f32[1,128], index: 4, kind: input, shape index: {}]   ;;  %s3908_s5 = inlined_call_operand.hbm [shape: f32[16,128], index: 5, kind: output, shape index: {}]  }
   0x1   :  { %3914 = sst [smem:[#allocation13_spill]] %s3905_s2 }
   0x2   :  { %10 = vsyncpa [#allocation3], 0 }
   0x3   :  { %12 = vsyncpa [#allocation3 + $0x1], 0 }
   0x4   :  { %13 = vsyncpa [#allocation6], 0 }
   0x5   :  { %14 = vsyncpa [#allocation4], 0 }
   0x6   :  { %16 = vsyncpa [#allocation4 + $0x1], 0  ;;  %s2946_s18 = smov 0   ;;  %s2948_s19 = smov 0  }
   0x7   :  { %s2950_s20 = smov 0   ;;  %s2952_s21 = smov 0  }
   0x8 LB: > { %s2967_s22 = sadd.s32 4294967295, %s2899_s21   ;;  %s2177_s23 = sadd.s32 4294967294, %s2899_s21   ;;  %s2899_s21 = sphi %s2952_s21, %s3938_s21   ;;  %s2895_s20 = sphi %s2950_s20, %s3937_s20   ;;  %s2891_s19 = sphi %s2948_s19, %s3936_s19   ;;  %s2887_s18 = sphi %s2946_s18, %s3935_s18  }
   0x9   : > { %s2971_s24 = sadd.s32 1, %s2899_s21   ;;  %s29_s25 = sadd.s32 1, %s2895_s20 }
   0xa   : > { %s26_s26 = ssub.s32 %s2899_s21, %s2971_s24  ;;  %p36_p0 = scmp.ne.s32.totalorder %s2895_s20, %s2891_s19 }
   0xb   : > { %p27_p1 = scmp.eq.s32.totalorder %s26_s26, 0  ;;  %p37_p2 = scmp.eq.s32.totalorder %s2899_s21, 0 }
   0xc   : > { %p42_p3 = scmp.ne.s32.totalorder %s2891_s19, %s2887_s18  ;;  %p3909_p4 = scmp.eq.s32.totalorder %s2967_s22, 0 }
   0xd   : > { %s2983_s27 = scalar_select %p27_p1, %s2895_s20, %s29_s25  }
   0xe   : > { %p2985_p5 = por %p37_p2, %p36_p0  ;;  %p2991_p6 = por %p3909_p4, %p42_p3 }
   0xf   : > { %3915 = sst [smem:[#allocation12_spill]] %s2983_s27  ;;  %p155_p7 = scmp.eq.s32.totalorder %s2967_s22, 1 }
  0x10   : > { %s3916_s28 = scalar_select %p2985_p5, 1, 0 }
  0x11   : > { %s3917_s29 = scalar_select %p2991_p6, 1, 0 }
  0x12   : > { %p161_p8 = scmp.eq.s32.totalorder %s2177_s23, 1  ;;  %p2178_p9 = scmp.ge.s32.totalorder %s2899_s21, 1 }
  0x13   : > { %p168_p10 = scmp.lt.s32.totalorder %s2899_s21, 3  ;;  %p2998_p11 = por %p155_p7, %p36_p0 }
  0x14   : > { %p3002_p12 = por %p161_p8, %p42_p3  ;;  %s2901_s8 = smov [#allocation5]  }
  0x15   : > { %s3918_s30 = scalar_select %p2998_p11, 1, 0 }
  0x16   : > { %s3919_s6 = scalar_select %p3002_p12, 1, 0 }
  0x17   : > { %p3006_p13 = pnand %p2178_p9, %p168_p10  ;;  %s180_s9 = sshll.u32 %s2901_s8, 4  ;;  %s181_s9 = int_to_ptr.vmem [resolvable:$true] %s180_s9 }
  0x18   : > { %s2902_s11 = smov [#allocation7]   ;;  %s3922_s2 = sld [smem:[#allocation13_spill]] }
  0x19   : > { %s3920_s7 = scalar_select %p3006_p13, 1, 0 }
  0x1a   : > { %p2403_p1 = pneg %p3006_p13  ;;  %s193_s12 = sshll.u32 %s2902_s11, 4  ;;  %s194_s12 = int_to_ptr.vmem [resolvable:$true] %s193_s12 }
  0x1c   : > { %p3014_p2 = pnand %p2403_p1, %p3909_p4 }
  0x1e   : > { %s2743_s15 = scalar_lea.hbm %s3922_s2, 4096  ;;  %p2745_p8 = pneg %p3014_p2 }
  0x1f   : > { %p2744_p7 = scmp.ne.s32.totalorder %s3922_s2, %s2743_s15  ;;  %p2750_p1 = scmp.lt.u32.totalorder %s2743_s15, %s3922_s2 }
  0x21   : > { %p2746_p9 = pnand %p2745_p8, %p2744_p7 }
  0x23   : > { %p2747_p10 = pneg %p2746_p9 }
  0x25   : > { %p2752_p0 = pnand %p2750_p1, %p2747_p10 }
  0x27   : > { %2755 = shalt.err (!%p2752_p0)
}
  0x28   : > { %s2756_s26 = scalar_lea.vmem %s181_s9, 4096  ;;  %p2764_p11 = scmp.lt.s32.totalorder %s181_s9, %s181_s9 }
  0x29   : > { %p2757_p4 = scmp.ne.s32.totalorder %s181_s9, %s2756_s26  ;;  %p2765_p6 = scmp.lt.s32.totalorder %s2756_s26, %s2756_s26 }
  0x2b   : > { %p2759_p3 = pnand %p2757_p4, %p2745_p8  ;;  %p2766_p13 = por %p2765_p6, %p2764_p11 }
  0x2d   : > { %p2760_p12 = pneg %p2759_p3 }
  0x2f   : > { %p2767_p5 = pnand %p2766_p13, %p2760_p12 }
  0x31   : > { %2770 = shalt.err (!%p2767_p5)
}
  0x32   : > { %s2903_s8 = smov 256   ;;  %s2904_s11 = smov 16  }
  0x33   : > { %2406 = dma.hbm_to_vmem [thread:$0]  (!%p3014_p2), %s3922_s2, 4096, %s181_s9, [#allocation6], %s2903_s8, %s2903_s8, %s2904_s11  }
  0x34   : > { %p3923_p0 = scmp.ne.s32.totalorder %s3916_s28, 0  ;;  %p3924_p4 = scmp.lt.s32.totalorder %s2899_s21, 2 }
  0x35   : > { %s210_s16 = sand.u32 1, %s2895_s20   ;;  %s2771_s25 = scalar_lea.hbm %s3906_s3, 2048 }
  0x36   : > { %p3046_p3 = pnand %p3924_p4, %p3923_p0  ;;  %p2772_p5 = scmp.ne.s32.totalorder %s3906_s3, %s2771_s25 }
  0x37   : > { %p2778_p12 = scmp.lt.u32.totalorder %s2771_s25, %s3906_s3 }
  0x38   : > { %s3925_s15 = scalar_select %p3046_p3, 1, 0 }
  0x39   : > { %p2774_p6 = pnand %p2772_p5, %p2745_p8 }
  0x3b   : > { %p2775_p11 = pneg %p2774_p6 }
  0x3d   : > { %p2780_p13 = pnand %p2778_p12, %p2775_p11 }
  0x3f   : > { %2783 = shalt.err (!%p2780_p13)
}
  0x40   : > { %s2784_s8 = scalar_lea.vmem %s194_s12, 2048  ;;  %p2792_p1 = scmp.lt.s32.totalorder %s194_s12, %s194_s12 }
  0x41   : > { %p2785_p7 = scmp.ne.s32.totalorder %s194_s12, %s2784_s8  ;;  %p2793_p0 = scmp.lt.s32.totalorder %s2784_s8, %s2784_s8 }
  0x43   : > { %p2787_p9 = pnand %p2785_p7, %p2745_p8  ;;  %p2794_p4 = por %p2793_p0, %p2792_p1 }
  0x45   : > { %p2788_p10 = pneg %p2787_p9 }
  0x47   : > { %p2795_p3 = pnand %p2794_p4, %p2788_p10 }
  0x49   : > { %2798 = shalt.err (!%p2795_p3)
}
  0x4a   : > { %s2905_s27 = smov 128   ;;  %s2906_s11 = smov 8  }
  0x4b   : > { %2409 = dma.hbm_to_vmem [thread:$0]  (!%p3014_p2), %s3906_s3, 2048, %s194_s12, [#allocation6], %s2905_s27, %s2905_s27, %s2906_s11  }
  0x4c   : > { %s2389_s17 = smul.u32 384, %s210_s16  ;;  %s2312_s23 = sshll.u32 %s2899_s21, 9 }
  0x4d   : > { %s3075_s28 = scalar_lea.hbm %s3903_s0, %s2312_s23  ;;  %s3079_s10 = scalar_lea.sflag [#allocation3], %s210_s16 }
  0x4e   : > { %s214_s9 = scalar_lea.vmem [#allocation2], %s2389_s17  ;;  %s2799_s2 = scalar_lea.hbm %s3075_s28, 6144 }
  0x4f   : > { %s221_s8 = sshll.u32 %s214_s9, 4  ;;  %p2800_p8 = scmp.ne.s32.totalorder %s3075_s28, %s2799_s2  ;;  %s3077_s8 = int_to_ptr.vmem [resolvable:$true] %s221_s8 }
  0x50   : > { %p3926_p2 = scmp.ne.s32.totalorder %s3925_s15, 0  ;;  %s2804_s11 = scalar_lea.hbm %s3903_s0, 12288 }
  0x51   : > { %p2805_p11 = scmp.lt.u32.totalorder %s3075_s28, %s3903_s0  ;;  %p2806_p12 = scmp.lt.u32.totalorder %s2804_s11, %s2799_s2 }
  0x52   : > { %p2801_p3 = pneg %p3926_p2  ;;  %p2808_p7 = scmp.lt.u32.totalorder %s2799_s2, %s3075_s28 }
  0x53   : > { %p2807_p13 = por %p2806_p12, %p2805_p11 }
  0x54   : > { %p2802_p5 = pnand %p2801_p3, %p2800_p8 }
  0x55   : > { %p2809_p9 = por %p2808_p7, %p2807_p13 }
  0x56   : > { %p2803_p6 = pneg %p2802_p5 }
  0x58   : > { %p2810_p10 = pnand %p2809_p9, %p2803_p6 }
  0x5a   : > { %2813 = shalt.err (!%p2810_p10)
}
  0x5b   : > { %s2814_s16 = scalar_lea.vmem %s3077_s8, 6144  ;;  %s2907_s17 = smov [#allocation2]  }
  0x5c   : > { %p2815_p1 = scmp.ne.s32.totalorder %s3077_s8, %s2814_s16  ;;  %s2819_s23 = sshll.u32 %s2907_s17, 4  ;;  %s2820_s23 = int_to_ptr.vmem [resolvable:$false] %s2819_s23 }
  0x5d   : > { %s2821_s25 = scalar_lea.vmem %s2820_s23, 12288  ;;  %p2822_p8 = scmp.lt.s32.totalorder %s3077_s8, %s2820_s23 }
  0x5e   : > { %p2817_p0 = pnand %p2815_p1, %p2801_p3  ;;  %p2823_p5 = scmp.lt.s32.totalorder %s2821_s25, %s2814_s16 }
  0x60   : > { %p2818_p4 = pneg %p2817_p0  ;;  %p2824_p11 = por %p2823_p5, %p2822_p8 }
  0x62   : > { %p2825_p12 = pnand %p2824_p11, %p2818_p4 }
  0x64   : > { %2828 = shalt.err (!%p2825_p12)
}
  0x65   : > { %s2908_s2 = smov 1024   ;;  %s2909_s26 = smov 512  }
  0x66   : > { %s2910_s9 = smov 32   ;;  %p3927_p3 = scmp.ne.s32.totalorder %s3920_s7, 0 }
  0x67   : > { %2413 = dma.hbm_to_vmem [thread:$0]  (!%p3926_p2), %s3075_s28, 6144, %s3077_s8, %s3079_s10, %s2908_s2, %s2909_s26, %s2910_s9  }
  0x68   : > { %240 = sbr.rel (%p3927_p3) target bundleno = 3507 (0xdb3), region = 40  ;;  %s3110_s12 = sand.u32 (!%p3927_p3), 1, %s2891_s19  }
  0x69   : > { %s2390_s27 = smul.u32 (!%p3927_p3), 384, %s3110_s12  ;;  %s243_s11 = scalar_lea.sflag (!%p3927_p3), [#allocation3], %s3110_s12 }
  0x6a   : > { %p3928_p6 = scmp.ne.s32.totalorder (!%p3927_p3), %s3917_s29, 0 }
  0x6b   : > { %s3114_s13 = scalar_lea.vmem (!%p3927_p3), [#allocation2], %s2390_s27 }
  0x6f   : > { %2874 = dma.done.wait (%p3928_p6), %s243_s11, 6144  }
  0x70   : > { %2876 = vsyncadd (%p3928_p6), %s243_s11, 4294961152  ;;  %p3929_p2 = scmp.eq.s32.totalorder %s2967_s22, 0 }
  0x72   : > { %2878 = dma.done.wait (%p3929_p2), [#allocation6], 6144   ;;  %p3930_p13 = pmov %p3929_p2 }
  0x73   : > { %v2911_v0 = vmov 0   ;;  %v3128_v1 = vld [vmem:[#allocation5 + $0x4] ss:$16 sps:$4 sm:$0xff]   ;;  %v3130_v2 = vld [vmem:[#allocation5] ss:$16 sps:$4 sm:$0xff]   ;;  %p285_p7 = scmp.lt.s32.totalorder %s2967_s22, 1 }
  0x74   : > { %2880 = vsyncadd (%p3930_p13), [#allocation6], 4294961152  ;;  %519 = vmatprep.mubr.bf16.mxu0 %v2911_v0  ;;  %560 = vmatprep.mubr.bf16.mxu1 %v2911_v0  ;;  %v3133_v3 = vld [vmem:[#allocation5 + $0x24] ss:$16 sps:$4 sm:$0xff]   ;;  %v3136_v4 = vld [vmem:[#allocation5 + $0x20] ss:$16 sps:$4 sm:$0xff]  }
  0x75   : > { %2469 = vset.pattern.permute.xlu0 %v2911_v0  ;;  %2470 = vset.pattern.permute.xlu1 %v2911_v0  ;;  %v3139_v5 = vld [vmem:[#allocation5 + $0x44] ss:$16 sps:$4 sm:$0xff]   ;;  %v3141_v6 = vld [vmem:[#allocation5 + $0xc] ss:$16 sps:$4 sm:$0xff]   ;;  %v3143_v7 = vld [vmem:[#allocation5 + $0x8] ss:$16 sps:$4 sm:$0xff]  }
  0x76   : > { %487 = vmatprep.subr.bf16.mxu0 %v3128_v1  ;;  %v3147_v8 = vld [vmem:[#allocation5 + $0x40] ss:$16 sps:$4 sm:$0xff]   ;;  %528 = vmatprep.subr.bf16.mxu1 %v3141_v6  ;;  %v3151_v9 = vld [vmem:[#allocation5 + $0x64] ss:$16 sps:$4 sm:$0xff]   ;;  %v3154_v10 = vld [vmem:[#allocation5 + $0x2c] ss:$16 sps:$4 sm:$0xff]  }
  0x77   : > { %488 = vmatpush1.bf16.msra.mxu0 %v3130_v2  ;;  %529 = vmatpush1.bf16.msra.mxu1 %v3143_v7  ;;  %v3156_v11 = vld [vmem:[#allocation5 + $0x28] ss:$16 sps:$4 sm:$0xff]   ;;  %s286_s29 = scalar_select %p285_p7, %s2967_s22, 1  ;;  %v3161_v12 = vld [vmem:[#allocation5 + $0x60] ss:$16 sps:$4 sm:$0xff]  }
  0x78   : > { %489 = vmatprep.subr.bf16.mxu0 %v3133_v3  ;;  %530 = vmatprep.subr.bf16.mxu1 %v3154_v10  ;;  %v3163_v13 = vld [vmem:[#allocation5 + $0x84] ss:$16 sps:$4 sm:$0xff]   ;;  %v3165_v14 = vld [vmem:[#allocation5 + $0x4c] ss:$16 sps:$4 sm:$0xff]   ;;  %v3169_v15 = vld [vmem:[#allocation5 + $0x48] ss:$16 sps:$4 sm:$0xff]  }
  0x79   : > { %v3172_v16 = vld [vmem:[#allocation5 + $0x6c] ss:$16 sps:$4 sm:$0xff]   ;;  %v3175_v17 = vld [vmem:[#allocation5 + $0x80] ss:$16 sps:$4 sm:$0xff]   ;;  %s2188_s7 = sshll.u32 %s286_s29, 3  ;;  %s2187_s10 = sshll.u32 %s3110_s12, 3 }
  0x7a   : > { %v3178_v18 = vld [vmem:[#allocation5 + $0xa4] ss:$16 sps:$4 sm:$0xff]   ;;  %v3181_v19 = vld [vmem:[#allocation5 + $0x68] ss:$16 sps:$4 sm:$0xff]   ;;  %v3184_v20 = vld [vmem:[#allocation5 + $0x8c] ss:$16 sps:$4 sm:$0xff]   ;;  %s288_s8 = scalar_lea.vmem %s3904_s1, %s2188_s7 }
  0x7b   : > { %490 = vmatpush1.bf16.msra.mxu0 %v3136_v4  ;;  %531 = vmatpush1.bf16.msra.mxu1 %v3156_v11  ;;  %v3190_v21 = vld [vmem:[#allocation5 + $0xa0] ss:$16 sps:$4 sm:$0xff]   ;;  %v3192_v22 = vld [vmem:[#allocation5 + $0xc4] ss:$16 sps:$4 sm:$0xff]   ;;  %v3196_v23 = vld [vmem:[#allocation5 + $0x88] ss:$16 sps:$4 sm:$0xff]  }
  0x7c   : > { %491 = vmatprep.subr.bf16.mxu0 %v3139_v5  ;;  %532 = vmatprep.subr.bf16.mxu1 %v3165_v14  ;;  %v3199_v24 = vld [vmem:[#allocation5 + $0xac] ss:$16 sps:$4 sm:$0xff]   ;;  %v3201_v25 = vld [vmem:[%s288_s8] sm:$0xff]  ;;  %v3213_v29 = vld [vmem:[#allocation5 + $0xa8] ss:$16 sps:$4 sm:$0xff]   ;;  %s2309_s17 = sshll.u32 %s2967_s22, 7 }
  0x7d   : > { %vm597_vm0 = vcmp.gt.s32.totalorder %v3201_v25, 0  ;;  %v3205_v26 = vld [vmem:[#allocation5 + $0xc0] ss:$16 sps:$4 sm:$0xff]   ;;  %vm721_vm1 = vcmp.gt.s32.totalorder %v3201_v25, 1  ;;  %v3210_v28 = vld [vmem:[#allocation5 + $0xe4] ss:$16 sps:$4 sm:$0xff]   ;;  %s3859_s9 = scalar_lea.hbm %s3908_s5, %s2309_s17 }
  0x7e   : > { %v598_v27 = vsel %vm597_vm0, 1, %v2911_v0  ;;  %v3216_v30 = vld [vmem:[#allocation5 + $0xcc] ss:$16 sps:$4 sm:$0xff]   ;;  %v722_v31 = vsel %vm721_vm1, 1, %v2911_v0  ;;  %v3220_v32 = vld [vmem:[#allocation5 + $0xe0] ss:$16 sps:$4 sm:$0xff]  }
  0x7f   : > { %492 = vmatpush1.bf16.msra.mxu0 %v3147_v8  ;;  %533 = vmatpush1.bf16.msra.mxu1 %v3169_v15  ;;  %vm1093_vm2 = vcmp.gt.s32.totalorder %v3201_v25, 4  ;;  %v3225_v33 = vld [vmem:[#allocation5 + $0xc8] ss:$16 sps:$4 sm:$0xff]   ;;  %v3228_v34 = vld [vmem:[#allocation5 + $0xec] ss:$16 sps:$4 sm:$0xff]   ;;  %vm1341_vm3 = vcmp.gt.s32.totalorder %v3201_v25, 6 }
  0x80   : > { %493 = vmatprep.subr.bf16.mxu0 %v3151_v9  ;;  %534 = vmatprep.subr.bf16.mxu1 %v3172_v16  ;;  %v1094_v35 = vsel %vm1093_vm2, 1, %v2911_v0  ;;  %v3234_v36 = vld [vmem:[#allocation5 + $0xe8] ss:$16 sps:$4 sm:$0xff]   ;;  %v1342_v37 = vsel %vm1341_vm3, 1, %v2911_v0  ;;  %vm1589_vm4 = vcmp.gt.s32.totalorder %v3201_v25, 8  ;;  %vm1837_vm5 = vcmp.gt.s32.totalorder %v3201_v25, 10 }
  0x81   : > { %600 = vperm.xlu0 %2469, %v598_v27   ;;  %v1590_v38 = vsel %vm1589_vm4, 1, %v2911_v0  ;;  %v1838_v39 = vsel %vm1837_vm5, 1, %v2911_v0  ;;  %v323_v40 = vld [vmem:[%s3114_s13] sm:$0xff]  ;;  %v324_v41 = vld [vmem:[%s3114_s13 + $0x8] sm:$0xff]  ;;  %v326_v50 = vld [vmem:[%s3114_s13 + $0x18] sm:$0xff]  ;;  %vm845_vm8 = vcmp.gt.s32.totalorder %v3201_v25, 2 }
  0x82   : > { %v325_v56 = vld [vmem:[%s3114_s13 + $0x10] sm:$0xff]  ;;  %vm969_vm9 = vcmp.gt.s32.totalorder %v3201_v25, 3  ;;  %vm1217_vm10 = vcmp.gt.s32.totalorder %v3201_v25, 5  ;;  %vm1465_vm11 = vcmp.gt.s32.totalorder %v3201_v25, 7  ;;  %vm1713_vm12 = vcmp.gt.s32.totalorder %v3201_v25, 9  ;;  %s284_s23 = scalar_lea.vmem [#allocation8], %s2187_s10 }
  0x83   : > { %494 = vmatpush1.bf16.msra.mxu0 %v3161_v12  ;;  %535 = vmatpush1.bf16.msra.mxu1 %v3181_v19  ;;  %vm1961_vm13 = vcmp.gt.s32.totalorder %v3201_v25, 11  ;;  %s2076_s25 = sshll.u32 %s284_s23, 4  ;;  %s2063_s27 = scalar_lea.sflag [#allocation4], %s3110_s12  ;;  %s3861_s25 = int_to_ptr.vmem [resolvable:$true] %s2076_s25 }
  0x84   : > { %495 = vmatprep.subr.bf16.mxu0 %v3163_v13  ;;  %536 = vmatprep.subr.bf16.mxu1 %v3184_v20  ;;  %s2829_s11 = scalar_lea.vmem %s3861_s25, 128  ;;  %p3931_p10 = scmp.ne.s32.totalorder %s3918_s30, 0 }
  0x85   : > { %724 = vperm.xlu0 %2469, %v722_v31   ;;  %p2830_p9 = scmp.ne.s32.totalorder %s3861_s25, %s2829_s11  ;;  %s2915_s22 = smov [#allocation8]  }
  0x87   : > { %496 = vmatpush1.bf16.msra.mxu0 %v3175_v17  ;;  %537 = vmatpush1.bf16.msra.mxu1 %v3196_v23  ;;  %p2831_p1 = pnand %p2830_p9, %p3931_p10 }
  0x88   : > { %497 = vmatprep.subr.bf16.mxu0 %v3178_v18  ;;  %538 = vmatprep.subr.bf16.mxu1 %v3199_v24 }
  0x89   : > { %1096 = vperm.xlu0 %2469, %v1094_v35   ;;  %p2832_p0 = pneg %p2831_p1 }
  0x8b   : > { %498 = vmatpush1.bf16.msra.mxu0 %v3190_v21  ;;  %539 = vmatpush1.bf16.msra.mxu1 %v3213_v29 }
  0x8c   : > { %499 = vmatprep.subr.bf16.mxu0 %v3192_v22  ;;  %540 = vmatprep.subr.bf16.mxu1 %v3216_v30 }
  0x8d   : > { %1344 = vperm.xlu0 %2469, %v1342_v37  }
  0x8f   : > { %500 = vmatpush1.bf16.msra.mxu0 %v3205_v26  ;;  %541 = vmatpush1.bf16.msra.mxu1 %v3225_v33 }
  0x90   : > { %501 = vmatprep.subr.bf16.mxu0 %v3210_v28  ;;  %542 = vmatprep.subr.bf16.mxu1 %v3228_v34 }
  0x91   : > { %1592 = vperm.xlu0 %2469, %v1590_v38  }
  0x93   : > { %502 = vmatpush1.bf16.msra.mxu0 %v3220_v32  ;;  %543 = vmatpush1.bf16.msra.mxu1 %v3234_v36 }
  0x94   : > { %611 = vmatprep.subr.bf16.mxu0 %v3128_v1  ;;  %652 = vmatprep.subr.bf16.mxu1 %v3141_v6 }
  0x95   : > { %1840 = vperm.xlu0 %2469, %v1838_v39  }
  0x96   : > { %520 = vmatmul.mubr.bf16.vlgmr.msra.gmra.mrb[0].mxu0 %v2911_v0  ;;  %561 = vmatmul.mubr.bf16.vlgmr.msra.gmra.mrb[0].mxu1 %v2911_v0 }
  0x97   : > { %612 = vmatpush1.bf16.msra.mxu0 %v3130_v2  ;;  %643 = vmatprep.mubr.bf16.mxu0 %v2911_v0 }
  0x98   : > { %613 = vmatprep.subr.bf16.mxu0 %v3133_v3  ;;  %653 = vmatpush1.bf16.msra.mxu1 %v3143_v7 }
  0x99   : > { %654 = vmatprep.subr.bf16.mxu1 %v3154_v10  ;;  %684 = vmatprep.mubr.bf16.mxu1 %v2911_v0 }
  0x9b   : > { %614 = vmatpush1.bf16.msra.mxu0 %v3136_v4 }
  0x9c   : > { %615 = vmatprep.subr.bf16.mxu0 %v3139_v5  ;;  %655 = vmatpush1.bf16.msra.mxu1 %v3156_v11 }
  0x9d   : > { %656 = vmatprep.subr.bf16.mxu1 %v3165_v14 }
  0x9f   : > { %616 = vmatpush1.bf16.msra.mxu0 %v3147_v8 }
  0xa0   : > { %617 = vmatprep.subr.bf16.mxu0 %v3151_v9  ;;  %657 = vmatpush1.bf16.msra.mxu1 %v3169_v15 }
  0xa1   : > { %658 = vmatprep.subr.bf16.mxu1 %v3172_v16 }
  0xa3   : > { %618 = vmatpush1.bf16.msra.mxu0 %v3161_v12 }
  0xa4   : > { %619 = vmatprep.subr.bf16.mxu0 %v3163_v13  ;;  %659 = vmatpush1.bf16.msra.mxu1 %v3181_v19 }
  0xa5   : > { %660 = vmatprep.subr.bf16.mxu1 %v3184_v20 }
  0xa7   : > { %620 = vmatpush1.bf16.msra.mxu0 %v3175_v17 }
  0xa8   : > { %621 = vmatprep.subr.bf16.mxu0 %v3178_v18  ;;  %661 = vmatpush1.bf16.msra.mxu1 %v3196_v23 }
  0xa9   : > { %662 = vmatprep.subr.bf16.mxu1 %v3199_v24 }
  0xab   : > { %622 = vmatpush1.bf16.msra.mxu0 %v3190_v21 }
  0xac   : > { %623 = vmatprep.subr.bf16.mxu0 %v3192_v22  ;;  %663 = vmatpush1.bf16.msra.mxu1 %v3213_v29 }
  0xad   : > { %664 = vmatprep.subr.bf16.mxu1 %v3216_v30 }
  0xaf   : > { %624 = vmatpush1.bf16.msra.mxu0 %v3205_v26 }
  0xb0   : > { %625 = vmatprep.subr.bf16.mxu0 %v3210_v28  ;;  %665 = vmatpush1.bf16.msra.mxu1 %v3225_v33 }
  0xb1   : > { %666 = vmatprep.subr.bf16.mxu1 %v3228_v34 }
  0xb3   : > { %626 = vmatpush1.bf16.msra.mxu0 %v3220_v32 }
  0xb4   : > { %735 = vmatprep.subr.bf16.mxu0 %v3128_v1  ;;  %667 = vmatpush1.bf16.msra.mxu1 %v3234_v36 }
  0xb5   : > { %776 = vmatprep.subr.bf16.mxu1 %v3141_v6 }
 0x169   : > { %v521_v42 = vpop.f32.mrb[0].mxu0  ;;  %v562_v51 = vpop.f32.mrb[0].mxu1 }
 0x16a   : > { %v569_v43 = vadd.f32 %v521_v42, %v323_v40  ;;  %v523_v44 = vpop.f32.mrb[1].mxu0  ;;  %v564_v52 = vpop.f32.mrb[1].mxu1  ;;  %v571_v58 = vadd.f32 %v562_v51, %v325_v56  ;;  %v1962_v51 = vsel %vm1961_vm13, 1, %v2911_v0 }
 0x16b   : > { %v570_v45 = vadd.f32 %v523_v44, %v324_v41  ;;  %v525_v46 = vpop.f32.mrb[2].mxu0  ;;  %v572_v53 = vadd.f32 %v564_v52, %v326_v50  ;;  %v566_v54 = vpop.f32.mrb[2].mxu1  ;;  %v1714_v50 = vsel %vm1713_vm12, 1, %v2911_v0  ;;  %v2224_v52 = vld [vmem:[%s3114_s13 + $0x20] sm:$0xff] }
 0x16c   : > { %v2221_v47 = vmul.f32 -1.442695, %v569_v43  ;;  %v526_v48 = vpop.f32.mrb[3].mxu0  ;;  %v567_v55 = vpop.f32.mrb[3].mxu1  ;;  %v846_v46 = vsel %vm845_vm8, 1, %v2911_v0  ;;  %vm2913_vm8 = vmmov 0  }
 0x16d   : > { %v2222_v49 = vmul.f32 -1.442695, %v570_v45  ;;  %v2223_v57 = vmul.f32 -1.442695, %v572_v53  ;;  %v3288_v43 = vpop.permute.xlu0 %600  ;;  %848 = vperm.xlu1 %2470, %v846_v46   ;;  %v1218_v48 = vsel %vm1217_vm10, 1, %v2911_v0  ;;  %v2225_v53 = vld [vmem:[%s3114_s13 + $0x28] sm:$0xff] }
 0x16e   : > { %2519 = vpow2.f32 %v2221_v47  ;;  %vm602_vm6 = vcmp.eq.s32.totalorder %v3288_v43, 1  ;;  %v970_v47 = vsel %vm969_vm9, 1, %v2911_v0  ;;  %v2237_v43 = vld [vmem:[%s3114_s13 + $0x40] sm:$0xff] }
 0x16f   : > { %2521 = vpow2.f32 %v2222_v49  ;;  %vm2228_vm7 = vmpackc.low %vm602_vm6, %vm602_vm6  ;;  %v1466_v49 = vsel %vm1465_vm11, 1, %v2911_v0 }
 0x170   : > { %2523 = vpow2.f32 %v2223_v57 }
 0x171   : > { %2525 = vtanh.f32 %v571_v58  ;;  %972 = vperm.xlu1 %2470, %v970_v47  }
 0x175   : > { %1220 = vperm.xlu1 %2470, %v1218_v48  }
 0x178   : > { %v2520_v59 = vpop.eup %2519 }
 0x179   : > { %v2522_v60 = vpop.eup %2521  ;;  %v576_v61 = vadd.f32 1.0, %v2520_v59  ;;  %1468 = vperm.xlu1 %2470, %v1466_v49  }
 0x17a   : > { %v582_v62 = vadd.f32 1.0, %v2522_v60  ;;  %v2524_v63 = vpop.eup %2523 }
 0x17b   : > { %2527 = vrcp.f32 %v576_v61  ;;  %v2526_v27 = vpop.eup %2525  ;;  %v589_v35 = vadd.f32 1.0, %v2524_v63 }
 0x17c   : > { %2529 = vrcp.f32 %v582_v62 }
 0x17d   : > { %2531 = vrcp.f32 %v589_v35  ;;  %1716 = vperm.xlu1 %2470, %v1714_v50  }
 0x181   : > { %1964 = vperm.xlu1 %2470, %v1962_v51  }
 0x185   : > { %v2528_v31 = vpop.eup %2527 }
 0x186   : > { %v2530_v37 = vpop.eup %2529  ;;  %v593_v38 = vmul.f32 %v2528_v31, %v2526_v27  ;;  %v2227_v31 = vld [vmem:[%s3114_s13 + $0x38] sm:$0xff] }
 0x187   : > { %v592_v39 = vmul.f32 0.0, %v2530_v37  ;;  %v2532_v41 = vpop.eup %2531  ;;  %v2226_v37 = vld [vmem:[%s3114_s13 + $0x30] sm:$0xff] }
 0x189   : > { %v3285_v40 = vadd.f32 %v593_v38, %v592_v39 }
 0x18b   : > { %2533 = vtanh.f32 %v3285_v40  ;;  %v604_v51 = vsel %vm602_vm6, %v3285_v40, 0.0 }
 0x195   : > { %v2534_v42 = vpop.eup %2533 }
 0x196   : > { %v3290_v44 = vmul.f32 %v2534_v42, %v2532_v41 }
 0x198   : > { %v2229_v45 = vpack.c.bf16 %v3290_v44, %v3290_v44 }
 0x19a   : > { %2230 = vmatmul.mubr.msk.bf16.vlgmr.msra.gmra.mrb[4].mxu0 %vm2228_vm7, %v2229_v45  ;;  %2233 = vmatmul.mubr.msk.bf16.vlgmr.msra.gmra.mrb[4].mxu1 %vm2228_vm7, %v2229_v45 }
 0x19b   : > { %736 = vmatpush1.bf16.msra.mxu0 %v3130_v2  ;;  %777 = vmatpush1.bf16.msra.mxu1 %v3143_v7 }
 0x19c   : > { %737 = vmatprep.subr.bf16.mxu0 %v3133_v3  ;;  %778 = vmatprep.subr.bf16.mxu1 %v3154_v10 }
 0x19d   : > { %767 = vmatprep.mubr.bf16.mxu0 %v2911_v0  ;;  %808 = vmatprep.mubr.bf16.mxu1 %v2911_v0 }
 0x19f   : > { %738 = vmatpush1.bf16.msra.mxu0 %v3136_v4  ;;  %779 = vmatpush1.bf16.msra.mxu1 %v3156_v11 }
 0x1a0   : > { %739 = vmatprep.subr.bf16.mxu0 %v3139_v5  ;;  %780 = vmatprep.subr.bf16.mxu1 %v3165_v14 }
 0x1a3   : > { %740 = vmatpush1.bf16.msra.mxu0 %v3147_v8  ;;  %781 = vmatpush1.bf16.msra.mxu1 %v3169_v15 }
 0x1a4   : > { %741 = vmatprep.subr.bf16.mxu0 %v3151_v9  ;;  %782 = vmatprep.subr.bf16.mxu1 %v3172_v16 }
 0x1a7   : > { %742 = vmatpush1.bf16.msra.mxu0 %v3161_v12  ;;  %783 = vmatpush1.bf16.msra.mxu1 %v3181_v19 }
 0x1a8   : > { %743 = vmatprep.subr.bf16.mxu0 %v3163_v13  ;;  %784 = vmatprep.subr.bf16.mxu1 %v3184_v20 }
 0x1ab   : > { %744 = vmatpush1.bf16.msra.mxu0 %v3175_v17  ;;  %785 = vmatpush1.bf16.msra.mxu1 %v3196_v23 }
 0x1ac   : > { %745 = vmatprep.subr.bf16.mxu0 %v3178_v18  ;;  %786 = vmatprep.subr.bf16.mxu1 %v3199_v24 }
 0x1af   : > { %746 = vmatpush1.bf16.msra.mxu0 %v3190_v21  ;;  %787 = vmatpush1.bf16.msra.mxu1 %v3213_v29 }
 0x1b0   : > { %747 = vmatprep.subr.bf16.mxu0 %v3192_v22  ;;  %788 = vmatprep.subr.bf16.mxu1 %v3216_v30 }
 0x1b3   : > { %748 = vmatpush1.bf16.msra.mxu0 %v3205_v26  ;;  %789 = vmatpush1.bf16.msra.mxu1 %v3225_v33 }
 0x1b4   : > { %749 = vmatprep.subr.bf16.mxu0 %v3210_v28  ;;  %790 = vmatprep.subr.bf16.mxu1 %v3228_v34 }
 0x1b7   : > { %750 = vmatpush1.bf16.msra.mxu0 %v3220_v32  ;;  %791 = vmatpush1.bf16.msra.mxu1 %v3234_v36 }
 0x1b8   : > { %859 = vmatprep.subr.bf16.mxu0 %v3128_v1  ;;  %900 = vmatprep.subr.bf16.mxu1 %v3141_v6 }
 0x26d   : > { %v645_v54 = vpop.f32.mrb[4].mxu0  ;;  %v686_v55 = vpop.f32.mrb[4].mxu1 }
 0x26e   : > { %v693_v56 = vadd.f32 %v2224_v52, %v645_v54  ;;  %v647_v57 = vpop.f32.mrb[5].mxu0  ;;  %v688_v58 = vpop.f32.mrb[5].mxu1  ;;  %v695_v39 = vadd.f32 %v2226_v37, %v686_v55 }
 0x26f   : > { %v694_v59 = vadd.f32 %v2225_v53, %v647_v57  ;;  %v649_v60 = vpop.f32.mrb[6].mxu0  ;;  %v690_v61 = vpop.f32.mrb[6].mxu1  ;;  %v696_v35 = vadd.f32 %v2227_v31, %v688_v58 }
 0x270   : > { %v2234_v62 = vmul.f32 -1.442695, %v693_v56  ;;  %v650_v63 = vpop.f32.mrb[7].mxu0  ;;  %v691_v27 = vpop.f32.mrb[7].mxu1  ;;  %v603_v61 = vsel %vm602_vm6, %v3290_v44, 0.0  ;;  %v2238_v44 = vld [vmem:[%s3114_s13 + $0x48] sm:$0xff] }
 0x271   : > { %v2235_v25 = vmul.f32 -1.442695, %v694_v59  ;;  %v2236_v38 = vmul.f32 -1.442695, %v696_v35  ;;  %v725_v55 = vpop.permute.xlu0 %724 }
 0x272   : > { %2535 = vpow2.f32 %v2234_v62  ;;  %vm726_vm14 = vcmp.eq.s32.totalorder %v725_v55, 1 }
 0x273   : > { %2537 = vpow2.f32 %v2235_v25 }
 0x274   : > { %2539 = vpow2.f32 %v2236_v38 }
 0x275   : > { %2541 = vtanh.f32 %v695_v39 }
 0x27c   : > { %v2536_v41 = vpop.eup %2535 }
 0x27d   : > { %v2538_v42 = vpop.eup %2537  ;;  %v700_v45 = vadd.f32 1.0, %v2536_v41 }
 0x27e   : > { %v706_v46 = vadd.f32 1.0, %v2538_v42  ;;  %v2540_v47 = vpop.eup %2539 }
 0x27f   : > { %2543 = vrcp.f32 %v700_v45  ;;  %v2542_v48 = vpop.eup %2541  ;;  %v713_v53 = vadd.f32 1.0, %v2540_v47  ;;  %v2240_v47 = vld [vmem:[%s3114_s13 + $0x58] sm:$0xff] }
 0x280   : > { %2545 = vrcp.f32 %v706_v46 }
 0x281   : > { %2547 = vrcp.f32 %v713_v53 }
 0x289   : > { %v2544_v49 = vpop.eup %2543 }
 0x28a   : > { %v2546_v50 = vpop.eup %2545  ;;  %v717_v52 = vmul.f32 %v2544_v49, %v2542_v48  ;;  %v2239_v49 = vld [vmem:[%s3114_s13 + $0x50] sm:$0xff] }
 0x28b   : > { %v716_v54 = vmul.f32 %v2546_v50, %v604_v51  ;;  %v2548_v58 = vpop.eup %2547 }
 0x28d   : > { %v718_v56 = vadd.f32 %v717_v52, %v716_v54 }
 0x28f   : > { %2549 = vtanh.f32 %v718_v56  ;;  %v3351_v57 = vsel %vm726_vm14, %v718_v56, %v604_v51 }
 0x299   : > { %v2550_v59 = vpop.eup %2549 }
 0x29a   : > { %v720_v60 = vmul.f32 %v2550_v59, %v2548_v58 }
 0x29c   : > { %v3356_v62 = vsel %vm726_vm14, %v720_v60, %v603_v61 }
 0x29d   : > { %v734_v40 = vpack.c.bf16 %v3356_v62, %v3356_v62 }
 0x29f   : > { %768 = vmatmul.mubr.bf16.vlgmr.msra.gmra.mrb[8].mxu0 %v734_v40  ;;  %809 = vmatmul.mubr.bf16.vlgmr.msra.gmra.mrb[8].mxu1 %v734_v40 }
 0x2a0   : > { %860 = vmatpush1.bf16.msra.mxu0 %v3130_v2  ;;  %901 = vmatpush1.bf16.msra.mxu1 %v3143_v7 }
 0x2a1   : > { %861 = vmatprep.subr.bf16.mxu0 %v3133_v3  ;;  %902 = vmatprep.subr.bf16.mxu1 %v3154_v10 }
 0x2a2   : > { %891 = vmatprep.mubr.bf16.mxu0 %v2911_v0  ;;  %932 = vmatprep.mubr.bf16.mxu1 %v2911_v0 }
 0x2a4   : > { %862 = vmatpush1.bf16.msra.mxu0 %v3136_v4  ;;  %903 = vmatpush1.bf16.msra.mxu1 %v3156_v11 }
 0x2a5   : > { %863 = vmatprep.subr.bf16.mxu0 %v3139_v5  ;;  %904 = vmatprep.subr.bf16.mxu1 %v3165_v14 }
 0x2a8   : > { %864 = vmatpush1.bf16.msra.mxu0 %v3147_v8  ;;  %905 = vmatpush1.bf16.msra.mxu1 %v3169_v15 }
 0x2a9   : > { %865 = vmatprep.subr.bf16.mxu0 %v3151_v9  ;;  %906 = vmatprep.subr.bf16.mxu1 %v3172_v16 }
 0x2ac   : > { %866 = vmatpush1.bf16.msra.mxu0 %v3161_v12  ;;  %907 = vmatpush1.bf16.msra.mxu1 %v3181_v19 }
 0x2ad   : > { %867 = vmatprep.subr.bf16.mxu0 %v3163_v13  ;;  %908 = vmatprep.subr.bf16.mxu1 %v3184_v20 }
 0x2b0   : > { %868 = vmatpush1.bf16.msra.mxu0 %v3175_v17  ;;  %909 = vmatpush1.bf16.msra.mxu1 %v3196_v23 }
 0x2b1   : > { %869 = vmatprep.subr.bf16.mxu0 %v3178_v18  ;;  %910 = vmatprep.subr.bf16.mxu1 %v3199_v24 }
 0x2b4   : > { %870 = vmatpush1.bf16.msra.mxu0 %v3190_v21  ;;  %911 = vmatpush1.bf16.msra.mxu1 %v3213_v29 }
 0x2b5   : > { %871 = vmatprep.subr.bf16.mxu0 %v3192_v22  ;;  %912 = vmatprep.subr.bf16.mxu1 %v3216_v30 }
 0x2b8   : > { %872 = vmatpush1.bf16.msra.mxu0 %v3205_v26  ;;  %913 = vmatpush1.bf16.msra.mxu1 %v3225_v33 }
 0x2b9   : > { %873 = vmatprep.subr.bf16.mxu0 %v3210_v28  ;;  %914 = vmatprep.subr.bf16.mxu1 %v3228_v34 }
 0x2bc   : > { %874 = vmatpush1.bf16.msra.mxu0 %v3220_v32  ;;  %915 = vmatpush1.bf16.msra.mxu1 %v3234_v36 }
 0x2bd   : > { %983 = vmatprep.subr.bf16.mxu0 %v3128_v1  ;;  %1024 = vmatprep.subr.bf16.mxu1 %v3141_v6 }
 0x372   : > { %v769_v63 = vpop.f32.mrb[8].mxu0  ;;  %v810_v27 = vpop.f32.mrb[8].mxu1 }
 0x373   : > { %v817_v25 = vadd.f32 %v2237_v43, %v769_v63  ;;  %v771_v31 = vpop.f32.mrb[9].mxu0  ;;  %v812_v35 = vpop.f32.mrb[9].mxu1  ;;  %v819_v51 = vadd.f32 %v2239_v49, %v810_v27 }
 0x374   : > { %v818_v37 = vadd.f32 %v2238_v44, %v771_v31  ;;  %v773_v38 = vpop.f32.mrb[10].mxu0  ;;  %v814_v39 = vpop.f32.mrb[10].mxu1  ;;  %v820_v48 = vadd.f32 %v2240_v47, %v812_v35 }
 0x375   : > { %v2241_v41 = vmul.f32 -1.442695, %v817_v25  ;;  %v774_v42 = vpop.f32.mrb[11].mxu0  ;;  %v815_v45 = vpop.f32.mrb[11].mxu1 }
 0x376   : > { %v2242_v46 = vmul.f32 -1.442695, %v818_v37  ;;  %v2243_v50 = vmul.f32 -1.442695, %v820_v48  ;;  %v849_v43 = vpop.permute.xlu1 %848 }
 0x377   : > { %2551 = vpow2.f32 %v2241_v41  ;;  %vm850_vm15 = vcmp.eq.s32.totalorder %v849_v43, 1 }
 0x378   : > { %2553 = vpow2.f32 %v2242_v46 }
 0x379   : > { %2555 = vpow2.f32 %v2243_v50 }
 0x37a   : > { %2557 = vtanh.f32 %v819_v51 }
 0x381   : > { %v2552_v52 = vpop.eup %2551 }
 0x382   : > { %v2554_v53 = vpop.eup %2553  ;;  %v824_v54 = vadd.f32 1.0, %v2552_v52 }
 0x383   : > { %v830_v55 = vadd.f32 1.0, %v2554_v53  ;;  %v2556_v56 = vpop.eup %2555 }
 0x384   : > { %2559 = vrcp.f32 %v824_v54  ;;  %v2558_v58 = vpop.eup %2557  ;;  %v837_v61 = vadd.f32 1.0, %v2556_v56  ;;  %v2247_v54 = vld [vmem:[%s3114_s13 + $0x78] sm:$0xff]  ;;  %v2246_v56 = vld [vmem:[%s3114_s13 + $0x70] sm:$0xff] }
 0x385   : > { %2561 = vrcp.f32 %v830_v55 }
 0x386   : > { %2563 = vrcp.f32 %v837_v61 }
 0x38e   : > { %v2560_v59 = vpop.eup %2559 }
 0x38f   : > { %v2562_v60 = vpop.eup %2561  ;;  %v841_v40 = vmul.f32 %v2560_v59, %v2558_v58 }
 0x390   : > { %v840_v44 = vmul.f32 %v2562_v60, %v3351_v57  ;;  %v2564_v25 = vpop.eup %2563 }
 0x392   : > { %v842_v63 = vadd.f32 %v841_v40, %v840_v44 }
 0x394   : > { %2565 = vtanh.f32 %v842_v63  ;;  %v3400_v27 = vsel %vm850_vm15, %v842_v63, %v3351_v57  ;;  %v2244_v57 = vld [vmem:[%s3114_s13 + $0x60] sm:$0xff] }
 0x39e   : > { %v2566_v31 = vpop.eup %2565 }
 0x39f   : > { %v844_v35 = vmul.f32 %v2566_v31, %v2564_v25 }
 0x3a1   : > { %v3403_v37 = vsel %vm850_vm15, %v844_v35, %v3356_v62  ;;  %v2245_v62 = vld [vmem:[%s3114_s13 + $0x68] sm:$0xff] }
 0x3a2   : > { %v858_v38 = vpack.c.bf16 %v3403_v37, %v3403_v37 }
 0x3a4   : > { %892 = vmatmul.mubr.bf16.vlgmr.msra.gmra.mrb[12].mxu0 %v858_v38  ;;  %933 = vmatmul.mubr.bf16.vlgmr.msra.gmra.mrb[12].mxu1 %v858_v38 }
 0x3a5   : > { %984 = vmatpush1.bf16.msra.mxu0 %v3130_v2  ;;  %1025 = vmatpush1.bf16.msra.mxu1 %v3143_v7 }
 0x3a6   : > { %985 = vmatprep.subr.bf16.mxu0 %v3133_v3  ;;  %1026 = vmatprep.subr.bf16.mxu1 %v3154_v10 }
 0x3a7   : > { %1015 = vmatprep.mubr.bf16.mxu0 %v2911_v0  ;;  %1056 = vmatprep.mubr.bf16.mxu1 %v2911_v0 }
 0x3a9   : > { %986 = vmatpush1.bf16.msra.mxu0 %v3136_v4  ;;  %1027 = vmatpush1.bf16.msra.mxu1 %v3156_v11 }
 0x3aa   : > { %987 = vmatprep.subr.bf16.mxu0 %v3139_v5  ;;  %1028 = vmatprep.subr.bf16.mxu1 %v3165_v14 }
 0x3ad   : > { %988 = vmatpush1.bf16.msra.mxu0 %v3147_v8  ;;  %1029 = vmatpush1.bf16.msra.mxu1 %v3169_v15 }
 0x3ae   : > { %989 = vmatprep.subr.bf16.mxu0 %v3151_v9  ;;  %1030 = vmatprep.subr.bf16.mxu1 %v3172_v16 }
 0x3b1   : > { %990 = vmatpush1.bf16.msra.mxu0 %v3161_v12  ;;  %1031 = vmatpush1.bf16.msra.mxu1 %v3181_v19 }
 0x3b2   : > { %991 = vmatprep.subr.bf16.mxu0 %v3163_v13  ;;  %1032 = vmatprep.subr.bf16.mxu1 %v3184_v20 }
 0x3b5   : > { %992 = vmatpush1.bf16.msra.mxu0 %v3175_v17  ;;  %1033 = vmatpush1.bf16.msra.mxu1 %v3196_v23 }
 0x3b6   : > { %993 = vmatprep.subr.bf16.mxu0 %v3178_v18  ;;  %1034 = vmatprep.subr.bf16.mxu1 %v3199_v24 }
 0x3b9   : > { %994 = vmatpush1.bf16.msra.mxu0 %v3190_v21  ;;  %1035 = vmatpush1.bf16.msra.mxu1 %v3213_v29 }
 0x3ba   : > { %995 = vmatprep.subr.bf16.mxu0 %v3192_v22  ;;  %1036 = vmatprep.subr.bf16.mxu1 %v3216_v30 }
 0x3bd   : > { %996 = vmatpush1.bf16.msra.mxu0 %v3205_v26  ;;  %1037 = vmatpush1.bf16.msra.mxu1 %v3225_v33 }
 0x3be   : > { %997 = vmatprep.subr.bf16.mxu0 %v3210_v28  ;;  %1038 = vmatprep.subr.bf16.mxu1 %v3228_v34 }
 0x3c1   : > { %998 = vmatpush1.bf16.msra.mxu0 %v3220_v32  ;;  %1039 = vmatpush1.bf16.msra.mxu1 %v3234_v36 }
 0x3c2   : > { %1107 = vmatprep.subr.bf16.mxu0 %v3128_v1  ;;  %1148 = vmatprep.subr.bf16.mxu1 %v3141_v6 }
 0x477   : > { %v893_v39 = vpop.f32.mrb[12].mxu0  ;;  %v934_v41 = vpop.f32.mrb[12].mxu1 }
 0x478   : > { %v941_v42 = vadd.f32 %v2244_v57, %v893_v39  ;;  %v895_v45 = vpop.f32.mrb[13].mxu0  ;;  %v936_v46 = vpop.f32.mrb[13].mxu1  ;;  %v943_v59 = vadd.f32 %v2246_v56, %v934_v41 }
 0x479   : > { %v942_v47 = vadd.f32 %v2245_v62, %v895_v45  ;;  %v897_v48 = vpop.f32.mrb[14].mxu0  ;;  %v938_v49 = vpop.f32.mrb[14].mxu1  ;;  %v944_v55 = vadd.f32 %v2247_v54, %v936_v46 }
 0x47a   : > { %v2248_v50 = vmul.f32 -1.442695, %v941_v42  ;;  %v898_v51 = vpop.f32.mrb[15].mxu0  ;;  %v939_v52 = vpop.f32.mrb[15].mxu1 }
 0x47b   : > { %v2249_v53 = vmul.f32 -1.442695, %v942_v47  ;;  %v2250_v58 = vmul.f32 -1.442695, %v944_v55  ;;  %v973_v62 = vpop.permute.xlu1 %972 }
 0x47c   : > { %2567 = vpow2.f32 %v2248_v50  ;;  %vm974_vm0 = vcmp.eq.s32.totalorder %v973_v62, 1  ;;  %v3510_v62 = vld [vmem:[#allocation5 + $0x2c] ss:$16 sps:$4 sm:$0xff]  }
 0x47d   : > { %2569 = vpow2.f32 %v2249_v53 }
 0x47e   : > { %2571 = vpow2.f32 %v2250_v58 }
 0x47f   : > { %2573 = vtanh.f32 %v943_v59 }
 0x486   : > { %v2568_v60 = vpop.eup %2567 }
 0x487   : > { %v2570_v61 = vpop.eup %2569  ;;  %v948_v40 = vadd.f32 1.0, %v2568_v60  ;;  %v1097_v60 = vpop.permute.xlu0 %1096 }
 0x488   : > { %v954_v43 = vadd.f32 1.0, %v2570_v61  ;;  %v2572_v44 = vpop.eup %2571  ;;  %vm1098_vm1 = vcmp.eq.s32.totalorder %v1097_v60, 1 }
 0x489   : > { %2575 = vrcp.f32 %v948_v40  ;;  %v2574_v63 = vpop.eup %2573  ;;  %v961_v38 = vadd.f32 1.0, %v2572_v44 }
 0x48a   : > { %2577 = vrcp.f32 %v954_v43 }
 0x48b   : > { %2579 = vrcp.f32 %v961_v38  ;;  %v3504_v38 = vld [vmem:[#allocation5 + $0x8] ss:$16 sps:$4 sm:$0xff]  }
 0x493   : > { %v2576_v25 = vpop.eup %2575 }
 0x494   : > { %v2578_v31 = vpop.eup %2577  ;;  %v965_v35 = vmul.f32 %v2576_v25, %v2574_v63 }
 0x495   : > { %v964_v57 = vmul.f32 %v2578_v31, %v3400_v27  ;;  %v2580_v42 = vpop.eup %2579 }
 0x497   : > { %v966_v39 = vadd.f32 %v965_v35, %v964_v57  ;;  %v3501_v35 = vld [vmem:[#allocation5] ss:$16 sps:$4 sm:$0xff]   ;;  %v3507_v57 = vld [vmem:[#allocation5 + $0x24] ss:$16 sps:$4 sm:$0xff]  }
 0x499   : > { %2581 = vtanh.f32 %v966_v39  ;;  %v3447_v41 = vsel %vm974_vm0, %v966_v39, %v3400_v27  ;;  %v3515_v39 = vld [vmem:[#allocation5 + $0x20] ss:$16 sps:$4 sm:$0xff]  }
 0x4a3   : > { %v2582_v45 = vpop.eup %2581 }
 0x4a4   : > { %v968_v46 = vmul.f32 %v2582_v45, %v2580_v42  ;;  %v3521_v42 = vld [vmem:[#allocation5 + $0x44] ss:$16 sps:$4 sm:$0xff]   ;;  %v3524_v45 = vld [vmem:[#allocation5 + $0x4c] ss:$16 sps:$4 sm:$0xff]  }
 0x4a6   : > { %v3450_v47 = vsel %vm974_vm0, %v968_v46, %v3403_v37  ;;  %v3527_v46 = vld [vmem:[#allocation5 + $0x40] ss:$16 sps:$4 sm:$0xff]  }
 0x4a7   : > { %v982_v48 = vpack.c.bf16 %v3450_v47, %v3450_v47 }
 0x4a9   : > { %1016 = vmatmul.mubr.bf16.vlgmr.msra.gmra.mrb[16].mxu0 %v982_v48  ;;  %1057 = vmatmul.mubr.bf16.vlgmr.msra.gmra.mrb[16].mxu1 %v982_v48  ;;  %v3533_v48 = vld [vmem:[#allocation5 + $0x64] ss:$16 sps:$4 sm:$0xff]  }
 0x4aa   : > { %1108 = vmatpush1.bf16.msra.mxu0 %v3130_v2  ;;  %1149 = vmatpush1.bf16.msra.mxu1 %v3143_v7  ;;  %v2251_v2 = vld [vmem:[%s3114_s13 + $0x80] sm:$0xff] }
 0x4ab   : > { %1109 = vmatprep.subr.bf16.mxu0 %v3133_v3  ;;  %1150 = vmatprep.subr.bf16.mxu1 %v3154_v10  ;;  %v2252_v3 = vld [vmem:[%s3114_s13 + $0x88] sm:$0xff] }
 0x4ac   : > { %1139 = vmatprep.mubr.bf16.mxu0 %v2911_v0  ;;  %1180 = vmatprep.mubr.bf16.mxu1 %v2911_v0 }
 0x4ae   : > { %1110 = vmatpush1.bf16.msra.mxu0 %v3136_v4  ;;  %1151 = vmatpush1.bf16.msra.mxu1 %v3156_v11 }
 0x4af   : > { %1111 = vmatprep.subr.bf16.mxu0 %v3139_v5  ;;  %1152 = vmatprep.subr.bf16.mxu1 %v3165_v14 }
 0x4b2   : > { %1112 = vmatpush1.bf16.msra.mxu0 %v3147_v8  ;;  %1153 = vmatpush1.bf16.msra.mxu1 %v3169_v15 }
 0x4b3   : > { %1113 = vmatprep.subr.bf16.mxu0 %v3151_v9  ;;  %1154 = vmatprep.subr.bf16.mxu1 %v3172_v16 }
 0x4b6   : > { %1114 = vmatpush1.bf16.msra.mxu0 %v3161_v12  ;;  %1155 = vmatpush1.bf16.msra.mxu1 %v3181_v19 }
 0x4b7   : > { %1115 = vmatprep.subr.bf16.mxu0 %v3163_v13  ;;  %1156 = vmatprep.subr.bf16.mxu1 %v3184_v20 }
 0x4ba   : > { %1116 = vmatpush1.bf16.msra.mxu0 %v3175_v17  ;;  %1157 = vmatpush1.bf16.msra.mxu1 %v3196_v23  ;;  %v2253_v17 = vld [vmem:[%s3114_s13 + $0x90] sm:$0xff] }
 0x4bb   : > { %1117 = vmatprep.subr.bf16.mxu0 %v3178_v18  ;;  %1158 = vmatprep.subr.bf16.mxu1 %v3199_v24 }
 0x4be   : > { %1118 = vmatpush1.bf16.msra.mxu0 %v3190_v21  ;;  %1159 = vmatpush1.bf16.msra.mxu1 %v3213_v29 }
 0x4bf   : > { %1119 = vmatprep.subr.bf16.mxu0 %v3192_v22  ;;  %1160 = vmatprep.subr.bf16.mxu1 %v3216_v30 }
 0x4c2   : > { %1120 = vmatpush1.bf16.msra.mxu0 %v3205_v26  ;;  %1161 = vmatpush1.bf16.msra.mxu1 %v3225_v33 }
 0x4c3   : > { %1121 = vmatprep.subr.bf16.mxu0 %v3210_v28  ;;  %1162 = vmatprep.subr.bf16.mxu1 %v3228_v34 }
 0x4c6   : > { %1122 = vmatpush1.bf16.msra.mxu0 %v3220_v32  ;;  %1163 = vmatpush1.bf16.msra.mxu1 %v3234_v36 }
 0x4c7   : > { %1231 = vmatprep.subr.bf16.mxu0 %v3128_v1  ;;  %1272 = vmatprep.subr.bf16.mxu1 %v3141_v6  ;;  %v2254_v1 = vld [vmem:[%s3114_s13 + $0x98] sm:$0xff] }
 0x57c   : > { %v1017_v4 = vpop.f32.mrb[16].mxu0  ;;  %v1058_v5 = vpop.f32.mrb[16].mxu1 }
 0x57d   : > { %v1065_v7 = vadd.f32 %v2251_v2, %v1017_v4  ;;  %v1019_v8 = vpop.f32.mrb[17].mxu0  ;;  %v1060_v9 = vpop.f32.mrb[17].mxu1  ;;  %v1067_v27 = vadd.f32 %v2253_v17, %v1058_v5  ;;  %v3536_v2 = vld [vmem:[#allocation5 + $0x6c] ss:$16 sps:$4 sm:$0xff]   ;;  %v3543_v4 = vld [vmem:[#allocation5 + $0x84] ss:$16 sps:$4 sm:$0xff]  }
 0x57e   : > { %v1066_v10 = vadd.f32 %v2252_v3, %v1019_v8  ;;  %v1021_v11 = vpop.f32.mrb[18].mxu0  ;;  %v1062_v12 = vpop.f32.mrb[18].mxu1  ;;  %v1068_v6 = vadd.f32 %v2254_v1, %v1060_v9  ;;  %v3539_v3 = vld [vmem:[#allocation5 + $0x60] ss:$16 sps:$4 sm:$0xff]  }
 0x57f   : > { %v2255_v13 = vmul.f32 -1.442695, %v1065_v7  ;;  %v1022_v14 = vpop.f32.mrb[19].mxu0  ;;  %v1063_v15 = vpop.f32.mrb[19].mxu1  ;;  %v3547_v5 = vld [vmem:[#allocation5 + $0x80] ss:$16 sps:$4 sm:$0xff]  }
 0x580   : > { %v2256_v16 = vmul.f32 -1.442695, %v1066_v10  ;;  %v2257_v18 = vmul.f32 -1.442695, %v1068_v6  ;;  %v3551_v7 = vld [vmem:[#allocation5 + $0xa4] ss:$16 sps:$4 sm:$0xff]  }
 0x581   : > { %2583 = vpow2.f32 %v2255_v13  ;;  %v2261_v10 = vld [vmem:[%s3114_s13 + $0xb8] sm:$0xff]  ;;  %v2260_v12 = vld [vmem:[%s3114_s13 + $0xb0] sm:$0xff] }
 0x582   : > { %2585 = vpow2.f32 %v2256_v16 }
 0x583   : > { %2587 = vpow2.f32 %v2257_v18 }
 0x584   : > { %2589 = vtanh.f32 %v1067_v27 }
 0x58b   : > { %v2584_v37 = vpop.eup %2583 }
 0x58c   : > { %v2586_v49 = vpop.eup %2585  ;;  %v1072_v50 = vadd.f32 1.0, %v2584_v37 }
 0x58d   : > { %v1078_v51 = vadd.f32 1.0, %v2586_v49  ;;  %v2588_v52 = vpop.eup %2587 }
 0x58e   : > { %2591 = vrcp.f32 %v1072_v50  ;;  %v2590_v53 = vpop.eup %2589  ;;  %v1085_v58 = vadd.f32 1.0, %v2588_v52  ;;  %v1221_v52 = vpop.permute.xlu1 %1220 }
 0x58f   : > { %2593 = vrcp.f32 %v1078_v51  ;;  %vm1222_vm2 = vcmp.eq.s32.totalorder %v1221_v52, 1 }
 0x590   : > { %2595 = vrcp.f32 %v1085_v58 }
 0x598   : > { %v2592_v54 = vpop.eup %2591 }
 0x599   : > { %v2594_v55 = vpop.eup %2593  ;;  %v1089_v56 = vmul.f32 %v2592_v54, %v2590_v53 }
 0x59a   : > { %v1088_v59 = vmul.f32 %v2594_v55, %v3447_v41  ;;  %v2596_v43 = vpop.eup %2595 }
 0x59c   : > { %v1090_v61 = vadd.f32 %v1089_v56, %v1088_v59 }
 0x59e   : > { %2597 = vtanh.f32 %v1090_v61  ;;  %v3494_v40 = vsel %vm1098_vm1, %v1090_v61, %v3447_v41  ;;  %v3518_v41 = vld [vmem:[#allocation5 + $0x28] ss:$16 sps:$4 sm:$0xff]  }
 0x59f   : > { %v3599_v61 = vld [vmem:[#allocation5 + $0x68] ss:$16 sps:$4 sm:$0xff]  }
 0x5a8   : > { %v2598_v44 = vpop.eup %2597 }
 0x5a9   : > { %v1092_v63 = vmul.f32 %v2598_v44, %v2596_v43  ;;  %v3607_v43 = vld [vmem:[#allocation5 + $0x88] ss:$16 sps:$4 sm:$0xff]   ;;  %v3611_v44 = vld [vmem:[#allocation5 + $0xac] ss:$16 sps:$4 sm:$0xff]  }
 0x5ab   : > { %v3497_v25 = vsel %vm1098_vm1, %v1092_v63, %v3450_v47  ;;  %v3530_v47 = vld [vmem:[#allocation5 + $0x48] ss:$16 sps:$4 sm:$0xff]   ;;  %v3614_v63 = vld [vmem:[#allocation5 + $0xa0] ss:$16 sps:$4 sm:$0xff]  }
 0x5ac   : > { %v1106_v31 = vpack.c.bf16 %v3497_v25, %v3497_v25 }
 0x5ae   : > { %1140 = vmatmul.mubr.bf16.vlgmr.msra.gmra.mrb[20].mxu0 %v1106_v31  ;;  %1181 = vmatmul.mubr.bf16.vlgmr.msra.gmra.mrb[20].mxu1 %v1106_v31  ;;  %v3620_v31 = vld [vmem:[#allocation5 + $0xc4] ss:$16 sps:$4 sm:$0xff]  }
 0x5af   : > { %1232 = vmatpush1.bf16.msra.mxu0 %v3501_v35  ;;  %1273 = vmatpush1.bf16.msra.mxu1 %v3504_v38 }
 0x5b0   : > { %1233 = vmatprep.subr.bf16.mxu0 %v3507_v57  ;;  %1274 = vmatprep.subr.bf16.mxu1 %v3510_v62 }
 0x5b1   : > { %1263 = vmatprep.mubr.bf16.mxu0 %v2911_v0  ;;  %1304 = vmatprep.mubr.bf16.mxu1 %v2911_v0 }
 0x5b3   : > { %1234 = vmatpush1.bf16.msra.mxu0 %v3515_v39  ;;  %1275 = vmatpush1.bf16.msra.mxu1 %v3518_v41 }
 0x5b4   : > { %1235 = vmatprep.subr.bf16.mxu0 %v3521_v42  ;;  %1276 = vmatprep.subr.bf16.mxu1 %v3524_v45 }
 0x5b7   : > { %1236 = vmatpush1.bf16.msra.mxu0 %v3527_v46  ;;  %1277 = vmatpush1.bf16.msra.mxu1 %v3530_v47 }
 0x5b8   : > { %1237 = vmatprep.subr.bf16.mxu0 %v3533_v48  ;;  %1278 = vmatprep.subr.bf16.mxu1 %v3536_v2 }
 0x5bb   : > { %1238 = vmatpush1.bf16.msra.mxu0 %v3539_v3  ;;  %1279 = vmatpush1.bf16.msra.mxu1 %v3181_v19  ;;  %v3565_v19 = vld [vmem:[#allocation5 + $0x4] ss:$16 sps:$4 sm:$0xff]  }
 0x5bc   : > { %1239 = vmatprep.subr.bf16.mxu0 %v3543_v4  ;;  %1280 = vmatprep.subr.bf16.mxu1 %v3184_v20  ;;  %v3568_v20 = vld [vmem:[#allocation5 + $0xc] ss:$16 sps:$4 sm:$0xff]  }
 0x5bf   : > { %1240 = vmatpush1.bf16.msra.mxu0 %v3547_v5  ;;  %1281 = vmatpush1.bf16.msra.mxu1 %v3196_v23 }
 0x5c0   : > { %1241 = vmatprep.subr.bf16.mxu0 %v3551_v7  ;;  %1282 = vmatprep.subr.bf16.mxu1 %v3199_v24 }
 0x5c3   : > { %1242 = vmatpush1.bf16.msra.mxu0 %v3190_v21  ;;  %1283 = vmatpush1.bf16.msra.mxu1 %v3213_v29  ;;  %v2258_v21 = vld [vmem:[%s3114_s13 + $0xa0] sm:$0xff] }
 0x5c4   : > { %1243 = vmatprep.subr.bf16.mxu0 %v3192_v22  ;;  %1284 = vmatprep.subr.bf16.mxu1 %v3216_v30  ;;  %v2259_v22 = vld [vmem:[%s3114_s13 + $0xa8] sm:$0xff] }
 0x5c7   : > { %1244 = vmatpush1.bf16.msra.mxu0 %v3205_v26  ;;  %1285 = vmatpush1.bf16.msra.mxu1 %v3225_v33 }
 0x5c8   : > { %1245 = vmatprep.subr.bf16.mxu0 %v3210_v28  ;;  %1286 = vmatprep.subr.bf16.mxu1 %v3228_v34 }
 0x5cb   : > { %1246 = vmatpush1.bf16.msra.mxu0 %v3220_v32  ;;  %1287 = vmatpush1.bf16.msra.mxu1 %v3234_v36 }
 0x5cc   : > { %1355 = vmatprep.subr.bf16.mxu0 %v3565_v19  ;;  %1396 = vmatprep.subr.bf16.mxu1 %v3568_v20 }
 0x681   : > { %v1141_v23 = vpop.f32.mrb[20].mxu0  ;;  %v1182_v24 = vpop.f32.mrb[20].mxu1 }
 0x682   : > { %v1189_v26 = vadd.f32 %v2258_v21, %v1141_v23  ;;  %v1143_v28 = vpop.f32.mrb[21].mxu0  ;;  %v1184_v29 = vpop.f32.mrb[21].mxu1  ;;  %v1191_v14 = vadd.f32 %v2260_v12, %v1182_v24  ;;  %v3623_v21 = vld [vmem:[#allocation5 + $0xcc] ss:$16 sps:$4 sm:$0xff]   ;;  %v3629_v23 = vld [vmem:[#allocation5 + $0xc8] ss:$16 sps:$4 sm:$0xff]  }
 0x683   : > { %v1190_v30 = vadd.f32 %v2259_v22, %v1143_v28  ;;  %v1145_v32 = vpop.f32.mrb[22].mxu0  ;;  %v1186_v33 = vpop.f32.mrb[22].mxu1  ;;  %v1192_v11 = vadd.f32 %v2261_v10, %v1184_v29  ;;  %v3626_v22 = vld [vmem:[#allocation5 + $0xc0] ss:$16 sps:$4 sm:$0xff]   ;;  %v3632_v24 = vld [vmem:[#allocation5 + $0xe4] ss:$16 sps:$4 sm:$0xff]  }
 0x684   : > { %v2262_v34 = vmul.f32 -1.442695, %v1189_v26  ;;  %v1146_v36 = vpop.f32.mrb[23].mxu0  ;;  %v1187_v8 = vpop.f32.mrb[23].mxu1  ;;  %v3635_v26 = vld [vmem:[#allocation5 + $0xec] ss:$16 sps:$4 sm:$0xff]  }
 0x685   : > { %v2263_v9 = vmul.f32 -1.442695, %v1190_v30  ;;  %v2264_v13 = vmul.f32 -1.442695, %v1192_v11  ;;  %v3638_v28 = vld [vmem:[#allocation5 + $0xe0] ss:$16 sps:$4 sm:$0xff]  }
 0x686   : > { %2599 = vpow2.f32 %v2262_v34  ;;  %v3641_v29 = vld [vmem:[#allocation5 + $0xe8] ss:$16 sps:$4 sm:$0xff]   ;;  %v2265_v30 = vld [vmem:[%s3114_s13 + $0xc0] sm:$0xff] }
 0x687   : > { %2601 = vpow2.f32 %v2263_v9  ;;  %v2266_v32 = vld [vmem:[%s3114_s13 + $0xc8] sm:$0xff] }
 0x688   : > { %2603 = vpow2.f32 %v2264_v13 }
 0x689   : > { %2605 = vtanh.f32 %v1191_v14 }
 0x690   : > { %v2600_v15 = vpop.eup %2599 }
 0x691   : > { %v2602_v16 = vpop.eup %2601  ;;  %v1196_v1 = vadd.f32 1.0, %v2600_v15 }
 0x692   : > { %v1202_v6 = vadd.f32 1.0, %v2602_v16  ;;  %v2604_v17 = vpop.eup %2603 }
 0x693   : > { %2607 = vrcp.f32 %v1196_v1  ;;  %v2606_v18 = vpop.eup %2605  ;;  %v1209_v50 = vadd.f32 1.0, %v2604_v17  ;;  %v2268_v1 = vld [vmem:[%s3114_s13 + $0xd8] sm:$0xff]  ;;  %v2267_v17 = vld [vmem:[%s3114_s13 + $0xd0] sm:$0xff] }
 0x694   : > { %2609 = vrcp.f32 %v1202_v6 }
 0x695   : > { %2611 = vrcp.f32 %v1209_v50 }
 0x69d   : > { %v2608_v27 = vpop.eup %2607 }
 0x69e   : > { %v2610_v37 = vpop.eup %2609  ;;  %v1213_v49 = vmul.f32 %v2608_v27, %v2606_v18 }
 0x69f   : > { %v1212_v51 = vmul.f32 %v2610_v37, %v3494_v40  ;;  %v2612_v55 = vpop.eup %2611 }
 0x6a1   : > { %v1214_v53 = vadd.f32 %v1213_v49, %v1212_v51 }
 0x6a3   : > { %2613 = vtanh.f32 %v1214_v53  ;;  %v3577_v54 = vsel %vm1222_vm2, %v1214_v53, %v3494_v40  ;;  %v3603_v40 = vld [vmem:[#allocation5 + $0x8c] ss:$16 sps:$4 sm:$0xff]  }
 0x6ad   : > { %v2614_v56 = vpop.eup %2613 }
 0x6ae   : > { %v1216_v58 = vmul.f32 %v2614_v56, %v2612_v55 }
 0x6b0   : > { %v3580_v59 = vsel %vm1222_vm2, %v1216_v58, %v3497_v25  ;;  %v3617_v25 = vld [vmem:[#allocation5 + $0xa8] ss:$16 sps:$4 sm:$0xff]  }
 0x6b1   : > { %v1230_v60 = vpack.c.bf16 %v3580_v59, %v3580_v59 }
 0x6b3   : > { %1264 = vmatmul.mubr.bf16.vlgmr.msra.gmra.mrb[24].mxu0 %v1230_v60  ;;  %1305 = vmatmul.mubr.bf16.vlgmr.msra.gmra.mrb[24].mxu1 %v1230_v60 }
 0x6b4   : > { %1356 = vmatpush1.bf16.msra.mxu0 %v3501_v35  ;;  %1397 = vmatpush1.bf16.msra.mxu1 %v3504_v38 }
 0x6b5   : > { %1357 = vmatprep.subr.bf16.mxu0 %v3507_v57  ;;  %1398 = vmatprep.subr.bf16.mxu1 %v3510_v62 }
 0x6b6   : > { %1387 = vmatprep.mubr.bf16.mxu0 %v2911_v0  ;;  %1428 = vmatprep.mubr.bf16.mxu1 %v2911_v0 }
 0x6b8   : > { %1358 = vmatpush1.bf16.msra.mxu0 %v3515_v39  ;;  %1399 = vmatpush1.bf16.msra.mxu1 %v3518_v41 }
 0x6b9   : > { %1359 = vmatprep.subr.bf16.mxu0 %v3521_v42  ;;  %1400 = vmatprep.subr.bf16.mxu1 %v3524_v45 }
 0x6bc   : > { %1360 = vmatpush1.bf16.msra.mxu0 %v3527_v46  ;;  %1401 = vmatpush1.bf16.msra.mxu1 %v3530_v47 }
 0x6bd   : > { %1361 = vmatprep.subr.bf16.mxu0 %v3533_v48  ;;  %1402 = vmatprep.subr.bf16.mxu1 %v3536_v2 }
 0x6c0   : > { %1362 = vmatpush1.bf16.msra.mxu0 %v3539_v3  ;;  %1403 = vmatpush1.bf16.msra.mxu1 %v3599_v61 }
 0x6c1   : > { %1363 = vmatprep.subr.bf16.mxu0 %v3543_v4  ;;  %1404 = vmatprep.subr.bf16.mxu1 %v3603_v40 }
 0x6c4   : > { %1364 = vmatpush1.bf16.msra.mxu0 %v3547_v5  ;;  %1405 = vmatpush1.bf16.msra.mxu1 %v3607_v43 }
 0x6c5   : > { %1365 = vmatprep.subr.bf16.mxu0 %v3551_v7  ;;  %1406 = vmatprep.subr.bf16.mxu1 %v3611_v44 }
 0x6c8   : > { %1366 = vmatpush1.bf16.msra.mxu0 %v3614_v63  ;;  %1407 = vmatpush1.bf16.msra.mxu1 %v3617_v25 }
 0x6c9   : > { %1367 = vmatprep.subr.bf16.mxu0 %v3620_v31  ;;  %1408 = vmatprep.subr.bf16.mxu1 %v3623_v21 }
 0x6cc   : > { %1368 = vmatpush1.bf16.msra.mxu0 %v3626_v22  ;;  %1409 = vmatpush1.bf16.msra.mxu1 %v3629_v23 }
 0x6cd   : > { %1369 = vmatprep.subr.bf16.mxu0 %v3632_v24  ;;  %1410 = vmatprep.subr.bf16.mxu1 %v3635_v26 }
 0x6d0   : > { %1370 = vmatpush1.bf16.msra.mxu0 %v3638_v28  ;;  %1411 = vmatpush1.bf16.msra.mxu1 %v3641_v29 }
 0x6d1   : > { %1479 = vmatprep.subr.bf16.mxu0 %v3565_v19  ;;  %1520 = vmatprep.subr.bf16.mxu1 %v3568_v20 }
 0x786   : > { %v1265_v33 = vpop.f32.mrb[24].mxu0  ;;  %v1306_v34 = vpop.f32.mrb[24].mxu1 }
 0x787   : > { %v1313_v36 = vadd.f32 %v2265_v30, %v1265_v33  ;;  %v1267_v8 = vpop.f32.mrb[25].mxu0  ;;  %v1308_v9 = vpop.f32.mrb[25].mxu1  ;;  %v1315_v27 = vadd.f32 %v2267_v17, %v1306_v34 }
 0x788   : > { %v1314_v10 = vadd.f32 %v2266_v32, %v1267_v8  ;;  %v1269_v11 = vpop.f32.mrb[26].mxu0  ;;  %v1310_v12 = vpop.f32.mrb[26].mxu1  ;;  %v1316_v6 = vadd.f32 %v2268_v1, %v1308_v9 }
 0x789   : > { %v2269_v13 = vmul.f32 -1.442695, %v1313_v36  ;;  %v1270_v14 = vpop.f32.mrb[27].mxu0  ;;  %v1311_v15 = vpop.f32.mrb[27].mxu1 }
 0x78a   : > { %v2270_v16 = vmul.f32 -1.442695, %v1314_v10  ;;  %v2271_v18 = vmul.f32 -1.442695, %v1316_v6  ;;  %v1345_v32 = vpop.permute.xlu0 %1344 }
 0x78b   : > { %2615 = vpow2.f32 %v2269_v13  ;;  %vm1346_vm3 = vcmp.eq.s32.totalorder %v1345_v32, 1 }
 0x78c   : > { %2617 = vpow2.f32 %v2270_v16 }
 0x78d   : > { %2619 = vpow2.f32 %v2271_v18 }
 0x78e   : > { %2621 = vtanh.f32 %v1315_v27 }
 0x795   : > { %v2616_v37 = vpop.eup %2615 }
 0x796   : > { %v2618_v49 = vpop.eup %2617  ;;  %v1320_v50 = vadd.f32 1.0, %v2616_v37 }
 0x797   : > { %v1326_v51 = vadd.f32 1.0, %v2618_v49  ;;  %v2620_v52 = vpop.eup %2619 }
 0x798   : > { %2623 = vrcp.f32 %v1320_v50  ;;  %v2622_v53 = vpop.eup %2621  ;;  %v1333_v60 = vadd.f32 1.0, %v2620_v52  ;;  %v2275_v50 = vld [vmem:[%s3114_s13 + $0xf8] sm:$0xff]  ;;  %v2274_v52 = vld [vmem:[%s3114_s13 + $0xf0] sm:$0xff] }
 0x799   : > { %2625 = vrcp.f32 %v1326_v51 }
 0x79a   : > { %2627 = vrcp.f32 %v1333_v60 }
 0x7a2   : > { %v2624_v55 = vpop.eup %2623 }
 0x7a3   : > { %v2626_v56 = vpop.eup %2625  ;;  %v1337_v58 = vmul.f32 %v2624_v55, %v2622_v53 }
 0x7a4   : > { %v1336_v30 = vmul.f32 %v2626_v56, %v3577_v54  ;;  %v2628_v36 = vpop.eup %2627 }
 0x7a6   : > { %v1338_v33 = vadd.f32 %v1337_v58, %v1336_v30 }
 0x7a8   : > { %2629 = vtanh.f32 %v1338_v33  ;;  %v3652_v34 = vsel %vm1346_vm3, %v1338_v33, %v3577_v54  ;;  %v2272_v54 = vld [vmem:[%s3114_s13 + $0xe0] sm:$0xff] }
 0x7b2   : > { %v2630_v8 = vpop.eup %2629 }
 0x7b3   : > { %v1340_v9 = vmul.f32 %v2630_v8, %v2628_v36 }
 0x7b5   : > { %v3655_v10 = vsel %vm1346_vm3, %v1340_v9, %v3580_v59  ;;  %v2273_v59 = vld [vmem:[%s3114_s13 + $0xe8] sm:$0xff] }
 0x7b6   : > { %v1354_v11 = vpack.c.bf16 %v3655_v10, %v3655_v10 }
 0x7b8   : > { %1388 = vmatmul.mubr.bf16.vlgmr.msra.gmra.mrb[28].mxu0 %v1354_v11  ;;  %1429 = vmatmul.mubr.bf16.vlgmr.msra.gmra.mrb[28].mxu1 %v1354_v11 }
 0x7b9   : > { %1480 = vmatpush1.bf16.msra.mxu0 %v3501_v35  ;;  %1521 = vmatpush1.bf16.msra.mxu1 %v3504_v38 }
 0x7ba   : > { %1481 = vmatprep.subr.bf16.mxu0 %v3507_v57  ;;  %1522 = vmatprep.subr.bf16.mxu1 %v3510_v62 }
 0x7bb   : > { %1511 = vmatprep.mubr.bf16.mxu0 %v2911_v0  ;;  %1552 = vmatprep.mubr.bf16.mxu1 %v2911_v0 }
 0x7bd   : > { %1482 = vmatpush1.bf16.msra.mxu0 %v3515_v39  ;;  %1523 = vmatpush1.bf16.msra.mxu1 %v3518_v41 }
 0x7be   : > { %1483 = vmatprep.subr.bf16.mxu0 %v3521_v42  ;;  %1524 = vmatprep.subr.bf16.mxu1 %v3524_v45 }
 0x7c1   : > { %1484 = vmatpush1.bf16.msra.mxu0 %v3527_v46  ;;  %1525 = vmatpush1.bf16.msra.mxu1 %v3530_v47 }
 0x7c2   : > { %1485 = vmatprep.subr.bf16.mxu0 %v3533_v48  ;;  %1526 = vmatprep.subr.bf16.mxu1 %v3536_v2 }
 0x7c5   : > { %1486 = vmatpush1.bf16.msra.mxu0 %v3539_v3  ;;  %1527 = vmatpush1.bf16.msra.mxu1 %v3599_v61 }
 0x7c6   : > { %1487 = vmatprep.subr.bf16.mxu0 %v3543_v4  ;;  %1528 = vmatprep.subr.bf16.mxu1 %v3603_v40 }
 0x7c9   : > { %1488 = vmatpush1.bf16.msra.mxu0 %v3547_v5  ;;  %1529 = vmatpush1.bf16.msra.mxu1 %v3607_v43 }
 0x7ca   : > { %1489 = vmatprep.subr.bf16.mxu0 %v3551_v7  ;;  %1530 = vmatprep.subr.bf16.mxu1 %v3611_v44 }
 0x7cd   : > { %1490 = vmatpush1.bf16.msra.mxu0 %v3614_v63  ;;  %1531 = vmatpush1.bf16.msra.mxu1 %v3617_v25 }
 0x7ce   : > { %1491 = vmatprep.subr.bf16.mxu0 %v3620_v31  ;;  %1532 = vmatprep.subr.bf16.mxu1 %v3623_v21 }
 0x7d1   : > { %1492 = vmatpush1.bf16.msra.mxu0 %v3626_v22  ;;  %1533 = vmatpush1.bf16.msra.mxu1 %v3629_v23 }
 0x7d2   : > { %1493 = vmatprep.subr.bf16.mxu0 %v3632_v24  ;;  %1534 = vmatprep.subr.bf16.mxu1 %v3635_v26 }
 0x7d5   : > { %1494 = vmatpush1.bf16.msra.mxu0 %v3638_v28  ;;  %1535 = vmatpush1.bf16.msra.mxu1 %v3641_v29 }
 0x7d6   : > { %1603 = vmatprep.subr.bf16.mxu0 %v3565_v19  ;;  %1644 = vmatprep.subr.bf16.mxu1 %v3568_v20 }
 0x88b   : > { %v1389_v12 = vpop.f32.mrb[28].mxu0  ;;  %v1430_v13 = vpop.f32.mrb[28].mxu1 }
 0x88c   : > { %v1437_v14 = vadd.f32 %v2272_v54, %v1389_v12  ;;  %v1391_v15 = vpop.f32.mrb[29].mxu0  ;;  %v1432_v16 = vpop.f32.mrb[29].mxu1  ;;  %v1439_v55 = vadd.f32 %v2274_v52, %v1430_v13 }
 0x88d   : > { %v1438_v1 = vadd.f32 %v2273_v59, %v1391_v15  ;;  %v1393_v6 = vpop.f32.mrb[30].mxu0  ;;  %v1434_v17 = vpop.f32.mrb[30].mxu1  ;;  %v1440_v51 = vadd.f32 %v2275_v50, %v1432_v16 }
 0x88e   : > { %v2276_v18 = vmul.f32 -1.442695, %v1437_v14  ;;  %v1394_v27 = vpop.f32.mrb[31].mxu0  ;;  %v1435_v37 = vpop.f32.mrb[31].mxu1 }
 0x88f   : > { %v2277_v49 = vmul.f32 -1.442695, %v1438_v1  ;;  %v2278_v53 = vmul.f32 -1.442695, %v1440_v51  ;;  %v1469_v59 = vpop.permute.xlu1 %1468 }
 0x890   : > { %2631 = vpow2.f32 %v2276_v18  ;;  %vm1470_vm4 = vcmp.eq.s32.totalorder %v1469_v59, 1 }
 0x891   : > { %2633 = vpow2.f32 %v2277_v49 }
 0x892   : > { %2635 = vpow2.f32 %v2278_v53 }
 0x893   : > { %2637 = vtanh.f32 %v1439_v55 }
 0x89a   : > { %v2632_v56 = vpop.eup %2631 }
 0x89b   : > { %v2634_v58 = vpop.eup %2633  ;;  %v1444_v60 = vadd.f32 1.0, %v2632_v56 }
 0x89c   : > { %v1450_v30 = vadd.f32 1.0, %v2634_v58  ;;  %v2636_v32 = vpop.eup %2635 }
 0x89d   : > { %2639 = vrcp.f32 %v1444_v60  ;;  %v2638_v33 = vpop.eup %2637  ;;  %v1457_v11 = vadd.f32 1.0, %v2636_v32  ;;  %v2282_v60 = vld [vmem:[%s3114_s13 + $0x118] sm:$0xff]  ;;  %v2281_v32 = vld [vmem:[%s3114_s13 + $0x110] sm:$0xff] }
 0x89e   : > { %2641 = vrcp.f32 %v1450_v30 }
 0x89f   : > { %2643 = vrcp.f32 %v1457_v11 }
 0x8a7   : > { %v2640_v36 = vpop.eup %2639 }
 0x8a8   : > { %v2642_v8 = vpop.eup %2641  ;;  %v1461_v9 = vmul.f32 %v2640_v36, %v2638_v33 }
 0x8a9   : > { %v1460_v54 = vmul.f32 %v2642_v8, %v3652_v34  ;;  %v2644_v14 = vpop.eup %2643 }
 0x8ab   : > { %v1462_v12 = vadd.f32 %v1461_v9, %v1460_v54 }
 0x8ad   : > { %2645 = vtanh.f32 %v1462_v12  ;;  %v3699_v13 = vsel %vm1470_vm4, %v1462_v12, %v3652_v34  ;;  %v2279_v34 = vld [vmem:[%s3114_s13 + $0x100] sm:$0xff] }
 0x8b7   : > { %v2646_v15 = vpop.eup %2645 }
 0x8b8   : > { %v1464_v16 = vmul.f32 %v2646_v15, %v2644_v14 }
 0x8ba   : > { %v3702_v1 = vsel %vm1470_vm4, %v1464_v16, %v3655_v10  ;;  %v2280_v10 = vld [vmem:[%s3114_s13 + $0x108] sm:$0xff] }
 0x8bb   : > { %v1478_v6 = vpack.c.bf16 %v3702_v1, %v3702_v1 }
 0x8bd   : > { %1512 = vmatmul.mubr.bf16.vlgmr.msra.gmra.mrb[32].mxu0 %v1478_v6  ;;  %1553 = vmatmul.mubr.bf16.vlgmr.msra.gmra.mrb[32].mxu1 %v1478_v6 }
 0x8be   : > { %1604 = vmatpush1.bf16.msra.mxu0 %v3501_v35  ;;  %1645 = vmatpush1.bf16.msra.mxu1 %v3504_v38 }
 0x8bf   : > { %1605 = vmatprep.subr.bf16.mxu0 %v3507_v57  ;;  %1646 = vmatprep.subr.bf16.mxu1 %v3510_v62 }
 0x8c0   : > { %1635 = vmatprep.mubr.bf16.mxu0 %v2911_v0  ;;  %1676 = vmatprep.mubr.bf16.mxu1 %v2911_v0 }
 0x8c2   : > { %1606 = vmatpush1.bf16.msra.mxu0 %v3515_v39  ;;  %1647 = vmatpush1.bf16.msra.mxu1 %v3518_v41 }
 0x8c3   : > { %1607 = vmatprep.subr.bf16.mxu0 %v3521_v42  ;;  %1648 = vmatprep.subr.bf16.mxu1 %v3524_v45 }
 0x8c6   : > { %1608 = vmatpush1.bf16.msra.mxu0 %v3527_v46  ;;  %1649 = vmatpush1.bf16.msra.mxu1 %v3530_v47 }
 0x8c7   : > { %1609 = vmatprep.subr.bf16.mxu0 %v3533_v48  ;;  %1650 = vmatprep.subr.bf16.mxu1 %v3536_v2 }
 0x8ca   : > { %1610 = vmatpush1.bf16.msra.mxu0 %v3539_v3  ;;  %1651 = vmatpush1.bf16.msra.mxu1 %v3599_v61 }
 0x8cb   : > { %1611 = vmatprep.subr.bf16.mxu0 %v3543_v4  ;;  %1652 = vmatprep.subr.bf16.mxu1 %v3603_v40 }
 0x8ce   : > { %1612 = vmatpush1.bf16.msra.mxu0 %v3547_v5  ;;  %1653 = vmatpush1.bf16.msra.mxu1 %v3607_v43 }
 0x8cf   : > { %1613 = vmatprep.subr.bf16.mxu0 %v3551_v7  ;;  %1654 = vmatprep.subr.bf16.mxu1 %v3611_v44 }
 0x8d2   : > { %1614 = vmatpush1.bf16.msra.mxu0 %v3614_v63  ;;  %1655 = vmatpush1.bf16.msra.mxu1 %v3617_v25 }
 0x8d3   : > { %1615 = vmatprep.subr.bf16.mxu0 %v3620_v31  ;;  %1656 = vmatprep.subr.bf16.mxu1 %v3623_v21 }
 0x8d6   : > { %1616 = vmatpush1.bf16.msra.mxu0 %v3626_v22  ;;  %1657 = vmatpush1.bf16.msra.mxu1 %v3629_v23 }
 0x8d7   : > { %1617 = vmatprep.subr.bf16.mxu0 %v3632_v24  ;;  %1658 = vmatprep.subr.bf16.mxu1 %v3635_v26 }
 0x8da   : > { %1618 = vmatpush1.bf16.msra.mxu0 %v3638_v28  ;;  %1659 = vmatpush1.bf16.msra.mxu1 %v3641_v29 }
 0x8db   : > { %1727 = vmatprep.subr.bf16.mxu0 %v3565_v19  ;;  %1768 = vmatprep.subr.bf16.mxu1 %v3568_v20 }
 0x990   : > { %v1513_v17 = vpop.f32.mrb[32].mxu0  ;;  %v1554_v18 = vpop.f32.mrb[32].mxu1 }
 0x991   : > { %v1561_v27 = vadd.f32 %v2279_v34, %v1513_v17  ;;  %v1515_v37 = vpop.f32.mrb[33].mxu0  ;;  %v1556_v49 = vpop.f32.mrb[33].mxu1  ;;  %v1563_v36 = vadd.f32 %v2281_v32, %v1554_v18 }
 0x992   : > { %v1562_v50 = vadd.f32 %v2280_v10, %v1515_v37  ;;  %v1517_v51 = vpop.f32.mrb[34].mxu0  ;;  %v1558_v52 = vpop.f32.mrb[34].mxu1  ;;  %v1564_v30 = vadd.f32 %v2282_v60, %v1556_v49 }
 0x993   : > { %v2283_v53 = vmul.f32 -1.442695, %v1561_v27  ;;  %v1518_v55 = vpop.f32.mrb[35].mxu0  ;;  %v1559_v56 = vpop.f32.mrb[35].mxu1 }
 0x994   : > { %v2284_v58 = vmul.f32 -1.442695, %v1562_v50  ;;  %v2285_v33 = vmul.f32 -1.442695, %v1564_v30  ;;  %v1593_v10 = vpop.permute.xlu0 %1592 }
 0x995   : > { %2647 = vpow2.f32 %v2283_v53  ;;  %vm1594_vm5 = vcmp.eq.s32.totalorder %v1593_v10, 1 }
 0x996   : > { %2649 = vpow2.f32 %v2284_v58 }
 0x997   : > { %2651 = vpow2.f32 %v2285_v33 }
 0x998   : > { %2653 = vtanh.f32 %v1563_v36 }
 0x99f   : > { %v2648_v8 = vpop.eup %2647 }
 0x9a0   : > { %v2650_v9 = vpop.eup %2649  ;;  %v1568_v11 = vadd.f32 1.0, %v2648_v8 }
 0x9a1   : > { %v1574_v54 = vadd.f32 1.0, %v2650_v9  ;;  %v2652_v59 = vpop.eup %2651 }
 0x9a2   : > { %2655 = vrcp.f32 %v1568_v11  ;;  %v2654_v12 = vpop.eup %2653  ;;  %v1581_v6 = vadd.f32 1.0, %v2652_v59  ;;  %v2288_v11 = vld [vmem:[%s3114_s13 + $0x130] sm:$0xff] }
 0x9a3   : > { %2657 = vrcp.f32 %v1574_v54 }
 0x9a4   : > { %2659 = vrcp.f32 %v1581_v6 }
 0x9ac   : > { %v2656_v14 = vpop.eup %2655 }
 0x9ad   : > { %v2658_v15 = vpop.eup %2657  ;;  %v1585_v16 = vmul.f32 %v2656_v14, %v2654_v12 }
 0x9ae   : > { %v1584_v34 = vmul.f32 %v2658_v15, %v3699_v13  ;;  %v2660_v27 = vpop.eup %2659 }
 0x9b0   : > { %v1586_v17 = vadd.f32 %v1585_v16, %v1584_v34 }
 0x9b2   : > { %2661 = vtanh.f32 %v1586_v17  ;;  %v3746_v18 = vsel %vm1594_vm5, %v1586_v17, %v3699_v13  ;;  %v2286_v13 = vld [vmem:[%s3114_s13 + $0x120] sm:$0xff] }
 0x9bc   : > { %v2662_v37 = vpop.eup %2661 }
 0x9bd   : > { %v1588_v49 = vmul.f32 %v2662_v37, %v2660_v27 }
 0x9bf   : > { %v3749_v50 = vsel %vm1594_vm5, %v1588_v49, %v3702_v1  ;;  %v2287_v1 = vld [vmem:[%s3114_s13 + $0x128] sm:$0xff] }
 0x9c0   : > { %v1602_v51 = vpack.c.bf16 %v3749_v50, %v3749_v50 }
 0x9c2   : > { %1636 = vmatmul.mubr.bf16.vlgmr.msra.gmra.mrb[36].mxu0 %v1602_v51  ;;  %1677 = vmatmul.mubr.bf16.vlgmr.msra.gmra.mrb[36].mxu1 %v1602_v51  ;;  %v1717_v51 = vpop.permute.xlu1 %1716 }
 0x9c3   : > { %1728 = vmatpush1.bf16.msra.mxu0 %v3501_v35  ;;  %1769 = vmatpush1.bf16.msra.mxu1 %v3504_v38  ;;  %vm1718_vm6 = vcmp.eq.s32.totalorder %v1717_v51, 1 }
 0x9c4   : > { %1729 = vmatprep.subr.bf16.mxu0 %v3507_v57  ;;  %1770 = vmatprep.subr.bf16.mxu1 %v3510_v62 }
 0x9c5   : > { %1759 = vmatprep.mubr.bf16.mxu0 %v2911_v0  ;;  %1800 = vmatprep.mubr.bf16.mxu1 %v2911_v0 }
 0x9c7   : > { %1730 = vmatpush1.bf16.msra.mxu0 %v3515_v39  ;;  %1771 = vmatpush1.bf16.msra.mxu1 %v3518_v41 }
 0x9c8   : > { %1731 = vmatprep.subr.bf16.mxu0 %v3521_v42  ;;  %1772 = vmatprep.subr.bf16.mxu1 %v3524_v45 }
 0x9cb   : > { %1732 = vmatpush1.bf16.msra.mxu0 %v3527_v46  ;;  %1773 = vmatpush1.bf16.msra.mxu1 %v3530_v47 }
 0x9cc   : > { %1733 = vmatprep.subr.bf16.mxu0 %v3533_v48  ;;  %1774 = vmatprep.subr.bf16.mxu1 %v3536_v2 }
 0x9cf   : > { %1734 = vmatpush1.bf16.msra.mxu0 %v3539_v3  ;;  %1775 = vmatpush1.bf16.msra.mxu1 %v3599_v61 }
 0x9d0   : > { %1735 = vmatprep.subr.bf16.mxu0 %v3543_v4  ;;  %1776 = vmatprep.subr.bf16.mxu1 %v3603_v40 }
 0x9d3   : > { %1736 = vmatpush1.bf16.msra.mxu0 %v3547_v5  ;;  %1777 = vmatpush1.bf16.msra.mxu1 %v3607_v43 }
 0x9d4   : > { %1737 = vmatprep.subr.bf16.mxu0 %v3551_v7  ;;  %1778 = vmatprep.subr.bf16.mxu1 %v3611_v44 }
 0x9d7   : > { %1738 = vmatpush1.bf16.msra.mxu0 %v3614_v63  ;;  %1779 = vmatpush1.bf16.msra.mxu1 %v3617_v25 }
 0x9d8   : > { %1739 = vmatprep.subr.bf16.mxu0 %v3620_v31  ;;  %1780 = vmatprep.subr.bf16.mxu1 %v3623_v21 }
 0x9db   : > { %1740 = vmatpush1.bf16.msra.mxu0 %v3626_v22  ;;  %1781 = vmatpush1.bf16.msra.mxu1 %v3629_v23 }
 0x9dc   : > { %1741 = vmatprep.subr.bf16.mxu0 %v3632_v24  ;;  %1782 = vmatprep.subr.bf16.mxu1 %v3635_v26 }
 0x9df   : > { %1742 = vmatpush1.bf16.msra.mxu0 %v3638_v28  ;;  %1783 = vmatpush1.bf16.msra.mxu1 %v3641_v29 }
 0x9e0   : > { %1851 = vmatprep.subr.bf16.mxu0 %v3565_v19  ;;  %1892 = vmatprep.subr.bf16.mxu1 %v3568_v20  ;;  %v2289_v19 = vld [vmem:[%s3114_s13 + $0x138] sm:$0xff] }
 0xa95   : > { %v1637_v52 = vpop.f32.mrb[36].mxu0  ;;  %v1678_v53 = vpop.f32.mrb[36].mxu1 }
 0xa96   : > { %v1685_v55 = vadd.f32 %v2286_v13, %v1637_v52  ;;  %v1639_v56 = vpop.f32.mrb[37].mxu0  ;;  %v1680_v58 = vpop.f32.mrb[37].mxu1  ;;  %v1687_v59 = vadd.f32 %v2288_v11, %v1678_v53  ;;  %v1970_v11 = vld [vmem:[#allocation7 + $0x10] sm:$0xff] }
 0xa97   : > { %v1686_v60 = vadd.f32 %v2287_v1, %v1639_v56  ;;  %v1641_v30 = vpop.f32.mrb[38].mxu0  ;;  %v1682_v32 = vpop.f32.mrb[38].mxu1  ;;  %v1688_v20 = vadd.f32 %v2289_v19, %v1680_v58 }
 0xa98   : > { %v2290_v33 = vmul.f32 -1.442695, %v1685_v55  ;;  %v1642_v36 = vpop.f32.mrb[39].mxu0  ;;  %v1683_v8 = vpop.f32.mrb[39].mxu1 }
 0xa99   : > { %v2291_v9 = vmul.f32 -1.442695, %v1686_v60  ;;  %v2292_v54 = vmul.f32 -1.442695, %v1688_v20  ;;  %v1968_v8 = vld [vmem:[#allocation7] sm:$0xff]  ;;  %v2912_v20 = vmov 0.0|0.0  }
 0xa9a   : > { %2663 = vpow2.f32 %v2290_v33 }
 0xa9b   : > { %2665 = vpow2.f32 %v2291_v9  ;;  %v1969_v9 = vld [vmem:[#allocation7 + $0x8] sm:$0xff] }
 0xa9c   : > { %2667 = vpow2.f32 %v2292_v54  ;;  %v2366_v19 = vpack.c.bf16 %v1969_v9, %v1968_v8  ;;  %v1971_v54 = vld [vmem:[#allocation7 + $0x18] sm:$0xff]  ;;  %v2307_v8 = vld [vmem:[%s3907_s4] ss:$0 sm:$0xff] }
 0xa9d   : > { %2669 = vtanh.f32 %v1687_v59  ;;  %v2369_v59 = vpack.c.bf16 %v1971_v54, %v1970_v11 }
 0xaa4   : > { %v2664_v12 = vpop.eup %2663 }
 0xaa5   : > { %v2666_v14 = vpop.eup %2665  ;;  %v1692_v15 = vadd.f32 1.0, %v2664_v12  ;;  %v1972_v12 = vld [vmem:[#allocation7 + $0x20] sm:$0xff] }
 0xaa6   : > { %v1698_v16 = vadd.f32 1.0, %v2666_v14  ;;  %v2668_v6 = vpop.eup %2667  ;;  %v1973_v14 = vld [vmem:[#allocation7 + $0x28] sm:$0xff] }
 0xaa7   : > { %2671 = vrcp.f32 %v1692_v15  ;;  %v2670_v34 = vpop.eup %2669  ;;  %v1705_v37 = vadd.f32 1.0, %v2668_v6  ;;  %v2372_v15 = vpack.c.bf16 %v1973_v14, %v1972_v12  ;;  %v1975_v6 = vld [vmem:[#allocation7 + $0x38] sm:$0xff] }
 0xaa8   : > { %2673 = vrcp.f32 %v1698_v16  ;;  %v1974_v16 = vld [vmem:[#allocation7 + $0x30] sm:$0xff] }
 0xaa9   : > { %2675 = vrcp.f32 %v1705_v37  ;;  %v1978_v37 = vld [vmem:[#allocation7 + $0x50] sm:$0xff] }
 0xab1   : > { %v2672_v10 = vpop.eup %2671 }
 0xab2   : > { %v2674_v17 = vpop.eup %2673  ;;  %v1709_v27 = vmul.f32 %v2672_v10, %v2670_v34  ;;  %v2375_v34 = vpack.c.bf16 %v1975_v6, %v1974_v16  ;;  %v1976_v10 = vld [vmem:[#allocation7 + $0x40] sm:$0xff] }
 0xab3   : > { %v1708_v49 = vmul.f32 %v2674_v17, %v3746_v18  ;;  %v2676_v52 = vpop.eup %2675  ;;  %v1977_v17 = vld [vmem:[#allocation7 + $0x48] sm:$0xff] }
 0xab5   : > { %v1710_v13 = vadd.f32 %v1709_v27, %v1708_v49  ;;  %v2378_v27 = vpack.c.bf16 %v1977_v17, %v1976_v10  ;;  %v1979_v49 = vld [vmem:[#allocation7 + $0x58] sm:$0xff] }
 0xab6   : > { %v2381_v51 = vpack.c.bf16 %v1979_v49, %v1978_v37 }
 0xab7   : > { %2677 = vtanh.f32 %v1710_v13  ;;  %v3793_v1 = vsel %vm1718_vm6, %v1710_v13, %v3746_v18  ;;  %v1980_v13 = vld [vmem:[#allocation7 + $0x60] sm:$0xff] }
 0xac1   : > { %v2678_v53 = vpop.eup %2677 }
 0xac2   : > { %v1712_v55 = vmul.f32 %v2678_v53, %v2676_v52  ;;  %v2914_v52 = vmov 0.0  }
 0xac4   : > { %v3796_v56 = vsel %vm1718_vm6, %v1712_v55, %v3749_v50  ;;  %v1982_v55 = vld [vmem:[#allocation7 + $0x70] sm:$0xff] }
 0xac5   : > { %v1726_v58 = vpack.c.bf16 %v3796_v56, %v3796_v56 }
 0xac7   : > { %1760 = vmatmul.mubr.bf16.vlgmr.msra.gmra.mrb[40].mxu0 %v1726_v58  ;;  %1801 = vmatmul.mubr.bf16.vlgmr.msra.gmra.mrb[40].mxu1 %v1726_v58 }
 0xac8   : > { %1852 = vmatpush1.bf16.msra.mxu0 %v3501_v35  ;;  %1893 = vmatpush1.bf16.msra.mxu1 %v3504_v38  ;;  %v2294_v35 = vld [vmem:[%s3114_s13 + $0x148] sm:$0xff] }
 0xac9   : > { %1853 = vmatprep.subr.bf16.mxu0 %v3507_v57  ;;  %1894 = vmatprep.subr.bf16.mxu1 %v3510_v62 }
 0xaca   : > { %1883 = vmatprep.mubr.bf16.mxu0 %v2911_v0  ;;  %1924 = vmatprep.mubr.bf16.mxu1 %v2911_v0  ;;  %v2293_v0 = vld [vmem:[%s3114_s13 + $0x140] sm:$0xff] }
 0xacc   : > { %1854 = vmatpush1.bf16.msra.mxu0 %v3515_v39  ;;  %1895 = vmatpush1.bf16.msra.mxu1 %v3518_v41 }
 0xacd   : > { %1855 = vmatprep.subr.bf16.mxu0 %v3521_v42  ;;  %1896 = vmatprep.subr.bf16.mxu1 %v3524_v45 }
 0xad0   : > { %1856 = vmatpush1.bf16.msra.mxu0 %v3527_v46  ;;  %1897 = vmatpush1.bf16.msra.mxu1 %v3530_v47 }
 0xad1   : > { %1857 = vmatprep.subr.bf16.mxu0 %v3533_v48  ;;  %1898 = vmatprep.subr.bf16.mxu1 %v3536_v2 }
 0xad4   : > { %1858 = vmatpush1.bf16.msra.mxu0 %v3539_v3  ;;  %1899 = vmatpush1.bf16.msra.mxu1 %v3599_v61 }
 0xad5   : > { %1859 = vmatprep.subr.bf16.mxu0 %v3543_v4  ;;  %1900 = vmatprep.subr.bf16.mxu1 %v3603_v40  ;;  %v2296_v4 = vld [vmem:[%s3114_s13 + $0x158] sm:$0xff] }
 0xad8   : > { %1860 = vmatpush1.bf16.msra.mxu0 %v3547_v5  ;;  %1901 = vmatpush1.bf16.msra.mxu1 %v3607_v43 }
 0xad9   : > { %1861 = vmatprep.subr.bf16.mxu0 %v3551_v7  ;;  %1902 = vmatprep.subr.bf16.mxu1 %v3611_v44  ;;  %v2295_v7 = vld [vmem:[%s3114_s13 + $0x150] sm:$0xff] }
 0xadc   : > { %1862 = vmatpush1.bf16.msra.mxu0 %v3614_v63  ;;  %1903 = vmatpush1.bf16.msra.mxu1 %v3617_v25 }
 0xadd   : > { %1863 = vmatprep.subr.bf16.mxu0 %v3620_v31  ;;  %1904 = vmatprep.subr.bf16.mxu1 %v3623_v21 }
 0xae0   : > { %1864 = vmatpush1.bf16.msra.mxu0 %v3626_v22  ;;  %1905 = vmatpush1.bf16.msra.mxu1 %v3629_v23 }
 0xae1   : > { %1865 = vmatprep.subr.bf16.mxu0 %v3632_v24  ;;  %1906 = vmatprep.subr.bf16.mxu1 %v3635_v26 }
 0xae4   : > { %1866 = vmatpush1.bf16.msra.mxu0 %v3638_v28  ;;  %1907 = vmatpush1.bf16.msra.mxu1 %v3641_v29  ;;  %v1841_v28 = vpop.permute.xlu0 %1840 }
 0xae5   : > { %vm1842_vm7 = vcmp.eq.s32.totalorder %v1841_v28, 1  ;;  %2365 = vmatprep.subr.bf16.mxu0 %v2912_v20 }
 0xb9a   : > { %v1761_v38 = vpop.f32.mrb[40].mxu0  ;;  %v1802_v57 = vpop.f32.mrb[40].mxu1 }
 0xb9b   : > { %v1809_v62 = vadd.f32 %v2293_v0, %v1761_v38  ;;  %v1763_v39 = vpop.f32.mrb[41].mxu0  ;;  %v1804_v41 = vpop.f32.mrb[41].mxu1  ;;  %v1811_v40 = vadd.f32 %v2295_v7, %v1802_v57  ;;  %v2300_v0 = vld [vmem:[%s3114_s13 + $0x160] sm:$0xff]  ;;  %v2302_v7 = vld [vmem:[%s3114_s13 + $0x170] sm:$0xff] }
 0xb9c   : > { %v1810_v42 = vadd.f32 %v2294_v35, %v1763_v39  ;;  %v1765_v45 = vpop.f32.mrb[42].mxu0  ;;  %v1806_v46 = vpop.f32.mrb[42].mxu1  ;;  %v1812_v5 = vadd.f32 %v2296_v4, %v1804_v41  ;;  %v2301_v35 = vld [vmem:[%s3114_s13 + $0x168] sm:$0xff]  ;;  %v2303_v4 = vld [vmem:[%s3114_s13 + $0x178] sm:$0xff]  ;;  %s2833_s13 = sshll.u32 %s2915_s22, 4  ;;  %s2834_s13 = int_to_ptr.vmem [resolvable:$false] %s2833_s13 }
 0xb9d   : > { %v2297_v47 = vmul.f32 -1.442695, %v1809_v62  ;;  %v1766_v48 = vpop.f32.mrb[43].mxu0  ;;  %v1807_v2 = vpop.f32.mrb[43].mxu1  ;;  %s2835_s29 = scalar_lea.vmem %s2834_s13, 256  ;;  %p2836_p4 = scmp.lt.s32.totalorder %s3861_s25, %s2834_s13 }
 0xb9e   : > { %v2298_v3 = vmul.f32 -1.442695, %v1810_v42  ;;  %v2299_v61 = vmul.f32 -1.442695, %v1812_v5  ;;  %p2837_p8 = scmp.lt.s32.totalorder %s2835_s29, %s2829_s11 }
 0xb9f   : > { %2679 = vpow2.f32 %v2297_v47 }
 0xba0   : > { %2681 = vpow2.f32 %v2298_v3  ;;  %p2838_p5 = por %p2837_p8, %p2836_p4 }
 0xba1   : > { %2683 = vpow2.f32 %v2299_v61 }
 0xba2   : > { %2685 = vtanh.f32 %v1811_v40  ;;  %p2839_p11 = pnand %p2838_p5, %p2832_p0 }
 0xba9   : > { %v2680_v43 = vpop.eup %2679 }
 0xbaa   : > { %v2682_v44 = vpop.eup %2681  ;;  %v1816_v63 = vadd.f32 1.0, %v2680_v43 }
 0xbab   : > { %v1822_v25 = vadd.f32 1.0, %v2682_v44  ;;  %v2684_v31 = vpop.eup %2683 }
 0xbac   : > { %2687 = vrcp.f32 %v1816_v63  ;;  %v2686_v21 = vpop.eup %2685  ;;  %v1829_v26 = vadd.f32 1.0, %v2684_v31 }
 0xbad   : > { %2689 = vrcp.f32 %v1822_v25 }
 0xbae   : > { %2691 = vrcp.f32 %v1829_v26 }
 0xbb6   : > { %v2688_v22 = vpop.eup %2687 }
 0xbb7   : > { %v2690_v23 = vpop.eup %2689  ;;  %v1833_v24 = vmul.f32 %v2688_v22, %v2686_v21 }
 0xbb8   : > { %v1832_v29 = vmul.f32 %v2690_v23, %v3793_v1  ;;  %v2692_v60 = vpop.eup %2691 }
 0xbba   : > { %v1834_v18 = vadd.f32 %v1833_v24, %v1832_v29 }
 0xbbc   : > { %2693 = vtanh.f32 %v1834_v18  ;;  %v3838_v50 = vsel %vm1842_vm7, %v1834_v18, %v3793_v1  ;;  %v1981_v1 = vld [vmem:[#allocation7 + $0x68] sm:$0xff] }
 0xbbd   : > { %v2384_v53 = vpack.c.bf16 %v1981_v1, %v1980_v13 }
 0xbc6   : > { %v2694_v30 = vpop.eup %2693 }
 0xbc7   : > { %v1836_v32 = vmul.f32 %v2694_v30, %v2692_v60  ;;  %v1965_v60 = vpop.permute.xlu1 %1964 }
 0xbc8   : > { %vm1966_vm9 = vcmp.eq.s32.totalorder %v1965_v60, 1 }
 0xbc9   : > { %v3841_v33 = vsel %vm1842_vm7, %v1836_v32, %v3796_v56  ;;  %v1983_v56 = vld [vmem:[#allocation7 + $0x78] sm:$0xff] }
 0xbca   : > { %v1850_v36 = vpack.c.bf16 %v3841_v33, %v3841_v33  ;;  %v2387_v58 = vpack.c.bf16 %v1983_v56, %v1982_v55 }
 0xbcc   : > { %1884 = vmatmul.mubr.bf16.vlgmr.msra.gmra.mrb[44].mxu0 %v1850_v36  ;;  %1925 = vmatmul.mubr.bf16.vlgmr.msra.gmra.mrb[44].mxu1 %v1850_v36 }
 0xbcd   : > { %2367 = vmatpush3.bf16.msra.mxu0 %v2366_v19  ;;  %2362 = vmatprep.mubr.msk.f32.mxu0 %vm2913_vm8, %v2914_v52 }
 0xbce   : > { %2368 = vmatprep.subr.bf16.mxu0 %v2912_v20 }
 0xbd1   : > { %2370 = vmatpush3.bf16.msra.mxu0 %v2369_v59 }
 0xbd2   : > { %2371 = vmatprep.subr.bf16.mxu0 %v2912_v20 }
 0xbd5   : > { %2373 = vmatpush3.bf16.msra.mxu0 %v2372_v15 }
 0xbd6   : > { %2374 = vmatprep.subr.bf16.mxu0 %v2912_v20 }
 0xbd9   : > { %2376 = vmatpush3.bf16.msra.mxu0 %v2375_v34 }
 0xbda   : > { %2377 = vmatprep.subr.bf16.mxu0 %v2912_v20 }
 0xbdd   : > { %2379 = vmatpush3.bf16.msra.mxu0 %v2378_v27 }
 0xbde   : > { %2380 = vmatprep.subr.bf16.mxu0 %v2912_v20 }
 0xbe1   : > { %2382 = vmatpush3.bf16.msra.mxu0 %v2381_v51 }
 0xbe2   : > { %2383 = vmatprep.subr.bf16.mxu0 %v2912_v20 }
 0xbe5   : > { %2385 = vmatpush3.bf16.msra.mxu0 %v2384_v53 }
 0xbe6   : > { %2386 = vmatprep.subr.bf16.mxu0 %v2912_v20 }
 0xbe9   : > { %2388 = vmatpush3.bf16.msra.mxu0 %v2387_v58 }
 0xc9f   : > { %v1885_v38 = vpop.f32.mrb[44].mxu0  ;;  %v1926_v57 = vpop.f32.mrb[44].mxu1 }
 0xca0   : > { %v1933_v62 = vadd.f32 %v2300_v0, %v1885_v38  ;;  %v1887_v39 = vpop.f32.mrb[45].mxu0  ;;  %v1928_v41 = vpop.f32.mrb[45].mxu1  ;;  %v1935_v40 = vadd.f32 %v2302_v7, %v1926_v57 }
 0xca1   : > { %v1934_v42 = vadd.f32 %v2301_v35, %v1887_v39  ;;  %v1889_v45 = vpop.f32.mrb[46].mxu0  ;;  %v1930_v46 = vpop.f32.mrb[46].mxu1  ;;  %v1936_v5 = vadd.f32 %v2303_v4, %v1928_v41 }
 0xca2   : > { %v2304_v47 = vmul.f32 -1.442695, %v1933_v62  ;;  %v1890_v48 = vpop.f32.mrb[47].mxu0  ;;  %v1931_v2 = vpop.f32.mrb[47].mxu1 }
 0xca3   : > { %v2305_v3 = vmul.f32 -1.442695, %v1934_v42  ;;  %v2306_v61 = vmul.f32 -1.442695, %v1936_v5 }
 0xca4   : > { %2695 = vpow2.f32 %v2304_v47 }
 0xca5   : > { %2697 = vpow2.f32 %v2305_v3 }
 0xca6   : > { %2699 = vpow2.f32 %v2306_v61 }
 0xca7   : > { %2701 = vtanh.f32 %v1935_v40 }
 0xcae   : > { %v2696_v43 = vpop.eup %2695 }
 0xcaf   : > { %v2698_v44 = vpop.eup %2697  ;;  %v1940_v63 = vadd.f32 1.0, %v2696_v43 }
 0xcb0   : > { %v1946_v25 = vadd.f32 1.0, %v2698_v44  ;;  %v2700_v31 = vpop.eup %2699 }
 0xcb1   : > { %2703 = vrcp.f32 %v1940_v63  ;;  %v2702_v21 = vpop.eup %2701  ;;  %v1953_v26 = vadd.f32 1.0, %v2700_v31 }
 0xcb2   : > { %2705 = vrcp.f32 %v1946_v25 }
 0xcb3   : > { %2707 = vrcp.f32 %v1953_v26 }
 0xcbb   : > { %v2704_v22 = vpop.eup %2703 }
 0xcbc   : > { %v2706_v23 = vpop.eup %2705  ;;  %v1957_v24 = vmul.f32 %v2704_v22, %v2702_v21 }
 0xcbd   : > { %v1956_v28 = vmul.f32 %v2706_v23, %v3838_v50  ;;  %v2708_v18 = vpop.eup %2707 }
 0xcbf   : > { %v1958_v29 = vadd.f32 %v1957_v24, %v1956_v28 }
 0xcc1   : > { %2709 = vtanh.f32 %v1958_v29 }
 0xccb   : > { %v2710_v30 = vpop.eup %2709 }
 0xccc   : > { %v1960_v32 = vmul.f32 %v2710_v30, %v2708_v18 }
 0xcce   : > { %v1967_v36 = vsel %vm1966_vm9, %v1960_v32, %v3841_v33 }
 0xccf   : > { %2363 = vmatmul.mubr.f32.vlgmr.msra.gmra.mrb[48].mxu0 %v1967_v36 }
 0xda2   : > { %v2057_v50 = vpop.f32.mrb[48].mxu0 }
 0xda3   : > { %v2058_v9 = vadd.f32 %v2307_v8, %v2057_v50  ;;  %v2364_v19 = vpop.f32.mrb[49].mxu0 }
 0xda5   : > { %2061 = vst [vmem:[%s284_s23] sm:$0xff] %v2058_v9 }
 0xda6   : > { %2842 = shalt.err (!%p2839_p11)
}
 0xda7   : > { %s2843_s12 = scalar_lea.hbm %s3859_s9, 128  ;;  %s2847_s28 = scalar_lea.hbm %s3908_s5, 256 }
 0xda8   : > { %p2844_p12 = scmp.ne.s32.totalorder %s3859_s9, %s2843_s12  ;;  %p2848_p2 = scmp.lt.u32.totalorder %s3859_s9, %s3908_s5 }
 0xda9   : > { %p2849_p13 = scmp.lt.u32.totalorder %s2847_s28, %s2843_s12  ;;  %p2851_p9 = scmp.lt.u32.totalorder %s2843_s12, %s3859_s9 }
 0xdaa   : > { %p2845_p3 = pnand %p2844_p12, %p3931_p10 }
 0xdab   : > { %p2850_p7 = por %p2849_p13, %p2848_p2 }
 0xdac   : > { %p2846_p6 = pneg %p2845_p3 }
 0xdad   : > { %p2852_p1 = por %p2851_p9, %p2850_p7 }
 0xdaf   : > { %p2853_p0 = pnand %p2852_p1, %p2846_p6 }
 0xdb1   : > { %2856 = shalt.err (!%p2853_p0)
}
 0xdb2   : > { %2401 = dma.vmem_to_hbm [thread:$0]  (%p3931_p10), %s3861_s25, 128, %s3859_s9, %s2063_s27  }
 0xdb3 PF: > { %s2088_s14 = sand.u32 1, %s2887_s18   ;;  %p3932_p4 = scmp.ne.s32.totalorder %s3919_s6, 0 }
 0xdb4   : > { %p3933_p8 = scmp.ge.s32.totalorder %s2899_s21, 2  ;;  %s2089_s16 = scalar_lea.sflag [#allocation4], %s2088_s14 }
 0xdb6   : > { %p2415_p5 = pnand %p3933_p8, %p3932_p4 }
 0xdb8   : > { %2882 = dma.done.wait (!%p2415_p5), %s2089_s16, 128  }
 0xdb9   : > { %2884 = vsyncadd (!%p2415_p5), %s2089_s16, 4294967168  ;;  %s3934_s17 = sld [smem:[#allocation12_spill]]  ;;  %p19_p11 = scmp.ge.s32.totalorder %s2971_s24, 4  }
 0xdba   : > { %s3935_s18 = smov %s2891_s19  ;;  %s3936_s19 = smov %s2895_s20 }
 0xdbb   : > { %s3938_s21 = smov %s2971_s24  ;;  %21 = sbr.rel (!%p19_p11) target bundleno = 8 (0x8), region = 107 }
 0xdbf   : > { %s3937_s20 = smov %s3934_s17 }
 0xdc2   :  { %2094 = vsyncpa [#allocation3], 1 }
 0xdc3   :  { %2096 = vsyncpa [#allocation3 + $0x1], 1 }
 0xdc4   :  { %2097 = vsyncpa [#allocation6], 1 }
 0xdc5   :  { %2098 = vsyncpa [#allocation4], 1 }
 0xdc6   :  { %2100 = vsyncpa [#allocation4 + $0x1], 1 }

</bundles_post_ra>
